<compile_context>
chip_gen: v7x
topology: tpu7x:2x2x1
jax: 0.10.0
libtpu: 0.0.40
codegen_flags: <defaults>
</compile_context>

<pallas_src>
import numpy as np

import jax
import jax.numpy as jnp
from jax.experimental import pallas as pl
from jax.experimental.pallas import tpu as pltpu


# ------------------------------ fused kernel --------------------------------

def _lenet5_kernel(x_ref, wb1_ref, b1_ref, pc1_ref, pr1_ref,
                   wb2_ref, b2_ref, pc2_ref, pr2_ref,
                   w1_ref, bf1_ref, w2_ref, bf2_ref, w3_ref, bf3_ref,
                   o_ref, p1_ref, p2_ref, fc_ref):
    """One grid step == one image.  Layout: rows = image row, lanes = (col, chan)."""
    f32 = jnp.float32

    # conv1 (5x5, VALID) as 5 row-shifted banded matmuls, + bias + ReLU.
    y1 = jnp.dot(x_ref[0, 0:28, :], wb1_ref[0], preferred_element_type=f32)
    for di in range(1, 5):
        y1 = y1 + jnp.dot(x_ref[0, di:di + 28, :], wb1_ref[di],
                          preferred_element_type=f32)
    y1 = jnp.maximum(y1 + b1_ref[...], 0.0)                     # (28, 28*6)

    # avgpool1 (2x2 / stride 2) fused as row/col selection matmuls.
    p1_ref[...] = jnp.dot(
        pr1_ref[...],
        jnp.dot(y1, pc1_ref[...], preferred_element_type=f32),
        preferred_element_type=f32)                             # (14, 14*6)

    # conv2 (5x5, VALID) + bias + ReLU.
    y2 = jnp.dot(p1_ref[0:10, :], wb2_ref[0], preferred_element_type=f32)
    for di in range(1, 5):
        y2 = y2 + jnp.dot(p1_ref[di:di + 10, :], wb2_ref[di],
                          preferred_element_type=f32)
    y2 = jnp.maximum(y2 + b2_ref[...], 0.0)                     # (10, 10*16)

    # avgpool2 -> (5, 5*16); rows = i2, lanes = (j2, out_chan).
    p2_ref[...] = jnp.dot(
        pr2_ref[...],
        jnp.dot(y2, pc2_ref[...], preferred_element_type=f32),
        preferred_element_type=f32)

    # Flatten: pack the 5 rows into one 400-lane row (i2-major).  The
    # (i2, j2, chan) -> torch (chan, i2, j2) reorder is folded into fc1's
    # wrapper-permuted weight rows, so no in-kernel transpose is needed.
    for i2 in range(5):
        fc_ref[0:1, i2 * 80:(i2 + 1) * 80] = p2_ref[i2:i2 + 1, :]

    # fc1 -> fc2 -> fc3, bias + ReLU fused, all VMEM resident.
    h = jnp.maximum(
        jnp.dot(fc_ref[...], w1_ref[...], preferred_element_type=f32) + bf1_ref[...],
        0.0)
    h = jnp.maximum(
        jnp.dot(h, w2_ref[...], preferred_element_type=f32) + bf2_ref[...], 0.0)
    o_ref[0] = jnp.dot(h, w3_ref[...], preferred_element_type=f32) + bf3_ref[...]


# --------------------------- wrapper-side weight prep ------------------------

def _band_weights(w, out_w):
    """Banded matrices for a 5x5 VALID conv in (row, (col, chan)) layout.

    w: (O, C, K, K) torch-layout conv weight.
    Returns band of shape (K, in_w*C, out_w*O) with
        band[di, (j+dj)*C + c, j*O + o] = w[o, c, di, dj].
    """
    O, C, K, _ = w.shape
    in_w = out_w + K - 1
    sel = np.zeros((K, in_w, out_w), np.float32)
    for dj in range(K):
        for j in range(out_w):
            sel[dj, j + dj, j] = 1.0
    band = jnp.einsum('ocid,daj->iacjo', w, jnp.asarray(sel))
    return band.reshape(K, in_w * C, out_w * O)


def _pool_mats(out_hw, chans):
    """Selection matrices for a fused 2x2/stride-2 average pool (constants)."""
    in_hw = 2 * out_hw
    pr = np.zeros((out_hw, in_hw), np.float32)
    pc = np.zeros((in_hw * chans, out_hw * chans), np.float32)
    for i in range(out_hw):
        pr[i, 2 * i] = 0.5
        pr[i, 2 * i + 1] = 0.5
    for j in range(out_hw):
        for t in range(2):
            for c in range(chans):
                pc[(2 * j + t) * chans + c, j * chans + c] = 0.5
    return jnp.asarray(pr), jnp.asarray(pc)


def _full_spec(shape):
    n = len(shape)
    return pl.BlockSpec(tuple(shape), lambda b, n=n: (0,) * n)


# --------------------------------- forward ----------------------------------

@jax.jit
def lenet5_forward(params, x):
    """x: (B, in_channels, 32, 32) NCHW float32 -> (B, num_classes)."""
    B, C, H, W = x.shape
    assert H == 32 and W == 32, "LeNet-5 spec requires 32x32 inputs (5*5*16 flatten)."
    num_classes = params["fc3_b"].shape[0]

    # activations: (B, H, W*C), channel fastest on the lane axis (one small op).
    x3 = jnp.transpose(x, (0, 2, 3, 1)).reshape(B, H, W * C)

    # weight-side prep (small, batch independent; constant-folds if params are
    # compile-time constants).
    wb1 = _band_weights(params["conv1_w"], 28)            # (5, 32*C, 168)
    b1t = jnp.tile(params["conv1_b"], 28)[None, :]        # (1, 168)
    pr1, pc1 = _pool_mats(14, 6)                          # (14, 28), (168, 84)
    wb2 = _band_weights(params["conv2_w"], 10)            # (5, 84, 160)
    b2t = jnp.tile(params["conv2_b"], 10)[None, :]        # (1, 160)
    pr2, pc2 = _pool_mats(5, 16)                          # (5, 10), (160, 80)
    # fc1 rows reordered from torch's (chan, i, j) flatten to our (i, j, chan).
    w1p = params["fc1_w"].reshape(16, 5, 5, 120).transpose(1, 2, 0, 3).reshape(400, 120)
    bf1 = params["fc1_b"][None, :]
    w2 = params["fc2_w"]
    bf2 = params["fc2_b"][None, :]
    w3 = params["fc3_w"]
    bf3 = params["fc3_b"][None, :]

    out = pl.pallas_call(
        _lenet5_kernel,
        grid=(B,),
        out_shape=jax.ShapeDtypeStruct((B, 1, num_classes), jnp.float32),
        in_specs=[
            pl.BlockSpec((1, H, W * C), lambda b: (b, 0, 0)),
            _full_spec(wb1.shape), _full_spec(b1t.shape),
            _full_spec(pc1.shape), _full_spec(pr1.shape),
            _full_spec(wb2.shape), _full_spec(b2t.shape),
            _full_spec(pc2.shape), _full_spec(pr2.shape),
            _full_spec(w1p.shape), _full_spec(bf1.shape),
            _full_spec(w2.shape), _full_spec(bf2.shape),
            _full_spec(w3.shape), _full_spec(bf3.shape),
        ],
        out_specs=pl.BlockSpec((1, 1, num_classes), lambda b: (b, 0, 0)),
        scratch_shapes=[
            pltpu.VMEM((14, 14 * 6), jnp.float32),   # pooled conv1 output
            pltpu.VMEM((5, 5 * 16), jnp.float32),    # pooled conv2 output
            pltpu.VMEM((1, 400), jnp.float32),       # flattened fc input
        ],
        compiler_params=pltpu.CompilerParams(
            dimension_semantics=("parallel",)),      # v7x: one image per TC
    )(x3, wb1, b1t, pc1, pr1, wb2, b2t, pc2, pr2, w1p, bf1, w2, bf2, w3, bf3)
    return out.reshape(B, num_classes)


# ------------------------------- params / reference -------------------------

def init_params(key, in_channels, num_classes):
    """Deterministic synthetic params (shapes match the torch module)."""
    keys = jax.random.split(key, 10)

    def u(k, shape, fan_in):
        bound = 1.0 / jnp.sqrt(jnp.float32(fan_in))
        return jax.random.uniform(k, shape, jnp.float32, -bound, bound)

    return {
        "conv1_w": u(keys[0], (6, in_channels, 5, 5), in_channels * 25),
        "conv1_b": u(keys[1], (6,), in_channels * 25),
        "conv2_w": u(keys[2], (16, 6, 5, 5), 6 * 25),
        "conv2_b": u(keys[3], (16,), 6 * 25),
        "fc1_w":   u(keys[4], (5 * 5 * 16, 120), 5 * 5 * 16),
        "fc1_b":   u(keys[5], (120,), 5 * 5 * 16),
        "fc2_w":   u(keys[6], (120, 84), 120),
        "fc2_b":   u(keys[7], (84,), 120),
        "fc3_w":   u(keys[8], (84, num_classes), 84),
        "fc3_b":   u(keys[9], (num_classes,), 84),
    }


def _reference_forward(params, x):
    """Plain-JAX reference of the same nn.Sequential (for a self-check)."""
    hi = jax.lax.Precision.HIGHEST

    def conv(h, w, b):
        y = jax.lax.conv_general_dilated(
            h, w, window_strides=(1, 1), padding="VALID",
            dimension_numbers=("NCHW", "OIHW", "NCHW"), precision=hi)
        return jax.nn.relu(y + b[None, :, None, None])

    def pool(h):
        s = jax.lax.reduce_window(h, 0.0, jax.lax.add,
                                  (1, 1, 2, 2), (1, 1, 2, 2), "VALID")
        return s * 0.25

    h = pool(conv(x, params["conv1_w"], params["conv1_b"]))
    h = pool(conv(h, params["conv2_w"], params["conv2_b"]))
    h = h.reshape(h.shape[0], -1)
    h = jax.nn.relu(jnp.dot(h, params["fc1_w"], precision=hi) + params["fc1_b"])
    h = jax.nn.relu(jnp.dot(h, params["fc2_w"], precision=hi) + params["fc2_b"])
    return jnp.dot(h, params["fc3_w"], precision=hi) + params["fc3_b"]


if __name__ == "__main__":
    # img_size must be 32 for the 5*5*16 flatten size in the reference module.
    batch, in_channels, img_size, num_classes = 2, 3, 32, 10

    key = jax.random.PRNGKey(0)
    k_params, k_x = jax.random.split(key)
    params = init_params(k_params, in_channels, num_classes)
    x = jax.random.normal(k_x, (batch, in_channels, img_size, img_size), jnp.float32)

    out = lenet5_forward(params, x)
    out = jax.block_until_ready(out)
    assert out.shape == (batch, num_classes), out.shape

    # numerical self-check against a plain-JAX reference of the same module
    ref = jax.block_until_ready(_reference_forward(params, x))
    max_err = float(jnp.max(jnp.abs(out - ref)))
    assert max_err < 2e-2, f"kernel/reference mismatch: max abs err {max_err}"

    print("KERNEL_OK")
</pallas_src>

<mosaic_0001>
module attributes {stable_mosaic.version = 11 : i64} {
  func.func @_lenet5_kernel(%arg0: i32, %arg1: memref<1x32x96xf32, #tpu.memory_space<vmem>>, %arg2: memref<5x96x168xf32, #tpu.memory_space<vmem>>, %arg3: memref<1x168xf32, #tpu.memory_space<vmem>>, %arg4: memref<168x84xf32, #tpu.memory_space<vmem>>, %arg5: memref<14x28xf32, #tpu.memory_space<vmem>>, %arg6: memref<5x84x160xf32, #tpu.memory_space<vmem>>, %arg7: memref<1x160xf32, #tpu.memory_space<vmem>>, %arg8: memref<160x80xf32, #tpu.memory_space<vmem>>, %arg9: memref<5x10xf32, #tpu.memory_space<vmem>>, %arg10: memref<400x120xf32, #tpu.memory_space<vmem>>, %arg11: memref<1x120xf32, #tpu.memory_space<vmem>>, %arg12: memref<120x84xf32, #tpu.memory_space<vmem>>, %arg13: memref<1x84xf32, #tpu.memory_space<vmem>>, %arg14: memref<84x10xf32, #tpu.memory_space<vmem>>, %arg15: memref<1x10xf32, #tpu.memory_space<vmem>>, %arg16: memref<1x1x10xf32, #tpu.memory_space<vmem>>, %arg17: memref<14x84xf32, #tpu.memory_space<vmem>>, %arg18: memref<5x80xf32, #tpu.memory_space<vmem>>, %arg19: memref<1x400xf32, #tpu.memory_space<vmem>>) attributes {dimension_semantics = [#tpu.dimension_semantics<parallel>], iteration_bounds = array<i64: 2>, scalar_prefetch = 0 : i64, scratch_operands = 3 : i64, tpu.core_type = #tpu.core_type<tc>, window_params = [{transform_indices = @transform_0, window_bounds = array<i64: 1, 32, 96>}, {pipeline_mode = #tpu.pipeline_mode<synchronous>, transform_indices = @transform_1, window_bounds = array<i64: 5, 96, 168>}, {pipeline_mode = #tpu.pipeline_mode<synchronous>, transform_indices = @transform_2, window_bounds = array<i64: 1, 168>}, {pipeline_mode = #tpu.pipeline_mode<synchronous>, transform_indices = @transform_3, window_bounds = array<i64: 168, 84>}, {pipeline_mode = #tpu.pipeline_mode<synchronous>, transform_indices = @transform_4, window_bounds = array<i64: 14, 28>}, {pipeline_mode = #tpu.pipeline_mode<synchronous>, transform_indices = @transform_5, window_bounds = array<i64: 5, 84, 160>}, {pipeline_mode = #tpu.pipeline_mode<synchronous>, transform_indices = @transform_6, window_bounds = array<i64: 1, 160>}, {pipeline_mode = #tpu.pipeline_mode<synchronous>, transform_indices = @transform_7, window_bounds = array<i64: 160, 80>}, {pipeline_mode = #tpu.pipeline_mode<synchronous>, transform_indices = @transform_8, window_bounds = array<i64: 5, 10>}, {pipeline_mode = #tpu.pipeline_mode<synchronous>, transform_indices = @transform_9, window_bounds = array<i64: 400, 120>}, {pipeline_mode = #tpu.pipeline_mode<synchronous>, transform_indices = @transform_10, window_bounds = array<i64: 1, 120>}, {pipeline_mode = #tpu.pipeline_mode<synchronous>, transform_indices = @transform_11, window_bounds = array<i64: 120, 84>}, {pipeline_mode = #tpu.pipeline_mode<synchronous>, transform_indices = @transform_12, window_bounds = array<i64: 1, 84>}, {pipeline_mode = #tpu.pipeline_mode<synchronous>, transform_indices = @transform_13, window_bounds = array<i64: 84, 10>}, {pipeline_mode = #tpu.pipeline_mode<synchronous>, transform_indices = @transform_14, window_bounds = array<i64: 1, 10>}, {transform_indices = @transform_15, window_bounds = array<i64: 1, 1, 10>}]} {
    %c0 = arith.constant 0 : index
    %c0_0 = arith.constant 0 : index
    %c0_1 = arith.constant 0 : index
    %0 = vector.load %arg1[%c0, %c0_0, %c0_1] : memref<1x32x96xf32, #tpu.memory_space<vmem>>, vector<1x28x96xf32>
    %1 = vector.shape_cast %0 : vector<1x28x96xf32> to vector<28x96xf32>
    %c0_2 = arith.constant 0 : index
    %c0_3 = arith.constant 0 : index
    %c0_4 = arith.constant 0 : index
    %2 = vector.load %arg2[%c0_2, %c0_3, %c0_4] : memref<5x96x168xf32, #tpu.memory_space<vmem>>, vector<1x96x168xf32>
    %3 = vector.shape_cast %2 : vector<1x96x168xf32> to vector<96x168xf32>
    %cst = arith.constant dense<0.000000e+00> : vector<28x168xf32>
    %4 = tpu.matmul %1, %3, %cst {dimension_numbers = #tpu.dot_dimension_numbers<[1], [0], [0], [1], [0, 0, 1, 1], [], []>} : vector<28x96xf32>, vector<96x168xf32>, vector<28x168xf32> -> vector<28x168xf32>
    %c0_5 = arith.constant 0 : index
    %c1 = arith.constant 1 : index
    %c0_6 = arith.constant 0 : index
    %5 = vector.load %arg1[%c0_5, %c1, %c0_6] : memref<1x32x96xf32, #tpu.memory_space<vmem>>, vector<1x28x96xf32>
    %6 = vector.shape_cast %5 : vector<1x28x96xf32> to vector<28x96xf32>
    %c1_7 = arith.constant 1 : index
    %c0_8 = arith.constant 0 : index
    %c0_9 = arith.constant 0 : index
    %7 = vector.load %arg2[%c1_7, %c0_8, %c0_9] : memref<5x96x168xf32, #tpu.memory_space<vmem>>, vector<1x96x168xf32>
    %8 = vector.shape_cast %7 : vector<1x96x168xf32> to vector<96x168xf32>
    %cst_10 = arith.constant dense<0.000000e+00> : vector<28x168xf32>
    %9 = tpu.matmul %6, %8, %cst_10 {dimension_numbers = #tpu.dot_dimension_numbers<[1], [0], [0], [1], [0, 0, 1, 1], [], []>} : vector<28x96xf32>, vector<96x168xf32>, vector<28x168xf32> -> vector<28x168xf32>
    %10 = arith.addf %4, %9 : vector<28x168xf32>
    %c0_11 = arith.constant 0 : index
    %c2 = arith.constant 2 : index
    %c0_12 = arith.constant 0 : index
    %11 = vector.load %arg1[%c0_11, %c2, %c0_12] : memref<1x32x96xf32, #tpu.memory_space<vmem>>, vector<1x28x96xf32>
    %12 = vector.shape_cast %11 : vector<1x28x96xf32> to vector<28x96xf32>
    %c2_13 = arith.constant 2 : index
    %c0_14 = arith.constant 0 : index
    %c0_15 = arith.constant 0 : index
    %13 = vector.load %arg2[%c2_13, %c0_14, %c0_15] : memref<5x96x168xf32, #tpu.memory_space<vmem>>, vector<1x96x168xf32>
    %14 = vector.shape_cast %13 : vector<1x96x168xf32> to vector<96x168xf32>
    %cst_16 = arith.constant dense<0.000000e+00> : vector<28x168xf32>
    %15 = tpu.matmul %12, %14, %cst_16 {dimension_numbers = #tpu.dot_dimension_numbers<[1], [0], [0], [1], [0, 0, 1, 1], [], []>} : vector<28x96xf32>, vector<96x168xf32>, vector<28x168xf32> -> vector<28x168xf32>
    %16 = arith.addf %10, %15 : vector<28x168xf32>
    %c0_17 = arith.constant 0 : index
    %c3 = arith.constant 3 : index
    %c0_18 = arith.constant 0 : index
    %17 = vector.load %arg1[%c0_17, %c3, %c0_18] : memref<1x32x96xf32, #tpu.memory_space<vmem>>, vector<1x28x96xf32>
    %18 = vector.shape_cast %17 : vector<1x28x96xf32> to vector<28x96xf32>
    %c3_19 = arith.constant 3 : index
    %c0_20 = arith.constant 0 : index
    %c0_21 = arith.constant 0 : index
    %19 = vector.load %arg2[%c3_19, %c0_20, %c0_21] : memref<5x96x168xf32, #tpu.memory_space<vmem>>, vector<1x96x168xf32>
    %20 = vector.shape_cast %19 : vector<1x96x168xf32> to vector<96x168xf32>
    %cst_22 = arith.constant dense<0.000000e+00> : vector<28x168xf32>
    %21 = tpu.matmul %18, %20, %cst_22 {dimension_numbers = #tpu.dot_dimension_numbers<[1], [0], [0], [1], [0, 0, 1, 1], [], []>} : vector<28x96xf32>, vector<96x168xf32>, vector<28x168xf32> -> vector<28x168xf32>
    %22 = arith.addf %16, %21 : vector<28x168xf32>
    %c0_23 = arith.constant 0 : index
    %c4 = arith.constant 4 : index
    %c0_24 = arith.constant 0 : index
    %23 = vector.load %arg1[%c0_23, %c4, %c0_24] : memref<1x32x96xf32, #tpu.memory_space<vmem>>, vector<1x28x96xf32>
    %24 = vector.shape_cast %23 : vector<1x28x96xf32> to vector<28x96xf32>
    %c4_25 = arith.constant 4 : index
    %c0_26 = arith.constant 0 : index
    %c0_27 = arith.constant 0 : index
    %25 = vector.load %arg2[%c4_25, %c0_26, %c0_27] : memref<5x96x168xf32, #tpu.memory_space<vmem>>, vector<1x96x168xf32>
    %26 = vector.shape_cast %25 : vector<1x96x168xf32> to vector<96x168xf32>
    %cst_28 = arith.constant dense<0.000000e+00> : vector<28x168xf32>
    %27 = tpu.matmul %24, %26, %cst_28 {dimension_numbers = #tpu.dot_dimension_numbers<[1], [0], [0], [1], [0, 0, 1, 1], [], []>} : vector<28x96xf32>, vector<96x168xf32>, vector<28x168xf32> -> vector<28x168xf32>
    %28 = arith.addf %22, %27 : vector<28x168xf32>
    %c0_29 = arith.constant 0 : index
    %c0_30 = arith.constant 0 : index
    %29 = vector.load %arg3[%c0_29, %c0_30] : memref<1x168xf32, #tpu.memory_space<vmem>>, vector<1x168xf32>
    %30 = vector.broadcast %29 : vector<1x168xf32> to vector<28x168xf32>
    %31 = arith.addf %28, %30 : vector<28x168xf32>
    %cst_31 = arith.constant 0.000000e+00 : f32
    %32 = vector.broadcast %cst_31 : f32 to vector<28x168xf32>
    %33 = arith.maximumf %31, %32 : vector<28x168xf32>
    %c0_32 = arith.constant 0 : index
    %c0_33 = arith.constant 0 : index
    %34 = vector.load %arg5[%c0_32, %c0_33] : memref<14x28xf32, #tpu.memory_space<vmem>>, vector<14x28xf32>
    %c0_34 = arith.constant 0 : index
    %c0_35 = arith.constant 0 : index
    %35 = vector.load %arg4[%c0_34, %c0_35] : memref<168x84xf32, #tpu.memory_space<vmem>>, vector<168x84xf32>
    %cst_36 = arith.constant dense<0.000000e+00> : vector<28x84xf32>
    %36 = tpu.matmul %33, %35, %cst_36 {dimension_numbers = #tpu.dot_dimension_numbers<[1], [0], [0], [1], [0, 0, 1, 1], [], []>} : vector<28x168xf32>, vector<168x84xf32>, vector<28x84xf32> -> vector<28x84xf32>
    %cst_37 = arith.constant dense<0.000000e+00> : vector<14x84xf32>
    %37 = tpu.matmul %34, %36, %cst_37 {dimension_numbers = #tpu.dot_dimension_numbers<[1], [0], [0], [1], [0, 0, 1, 1], [], []>} : vector<14x28xf32>, vector<28x84xf32>, vector<14x84xf32> -> vector<14x84xf32>
    %c0_38 = arith.constant 0 : index
    %c0_39 = arith.constant 0 : index
    %38 = vector.load %arg17[%c0_38, %c0_39] : memref<14x84xf32, #tpu.memory_space<vmem>>, vector<14x84xf32>
    tpu.vector_store %arg17[%c0_38, %c0_39], %37 {strides = array<i32>} : memref<14x84xf32, #tpu.memory_space<vmem>>, vector<14x84xf32>,
    %c0_40 = arith.constant 0 : index
    %c0_41 = arith.constant 0 : index
    %39 = vector.load %arg17[%c0_40, %c0_41] : memref<14x84xf32, #tpu.memory_space<vmem>>, vector<10x84xf32>
    %c0_42 = arith.constant 0 : index
    %c0_43 = arith.constant 0 : index
    %c0_44 = arith.constant 0 : index
    %40 = vector.load %arg6[%c0_42, %c0_43, %c0_44] : memref<5x84x160xf32, #tpu.memory_space<vmem>>, vector<1x84x160xf32>
    %41 = vector.shape_cast %40 : vector<1x84x160xf32> to vector<84x160xf32>
    %cst_45 = arith.constant dense<0.000000e+00> : vector<10x160xf32>
    %42 = tpu.matmul %39, %41, %cst_45 {dimension_numbers = #tpu.dot_dimension_numbers<[1], [0], [0], [1], [0, 0, 1, 1], [], []>} : vector<10x84xf32>, vector<84x160xf32>, vector<10x160xf32> -> vector<10x160xf32>
    %c1_46 = arith.constant 1 : index
    %c0_47 = arith.constant 0 : index
    %43 = vector.load %arg17[%c1_46, %c0_47] : memref<14x84xf32, #tpu.memory_space<vmem>>, vector<10x84xf32>
    %c1_48 = arith.constant 1 : index
    %c0_49 = arith.constant 0 : index
    %c0_50 = arith.constant 0 : index
    %44 = vector.load %arg6[%c1_48, %c0_49, %c0_50] : memref<5x84x160xf32, #tpu.memory_space<vmem>>, vector<1x84x160xf32>
    %45 = vector.shape_cast %44 : vector<1x84x160xf32> to vector<84x160xf32>
    %cst_51 = arith.constant dense<0.000000e+00> : vector<10x160xf32>
    %46 = tpu.matmul %43, %45, %cst_51 {dimension_numbers = #tpu.dot_dimension_numbers<[1], [0], [0], [1], [0, 0, 1, 1], [], []>} : vector<10x84xf32>, vector<84x160xf32>, vector<10x160xf32> -> vector<10x160xf32>
    %47 = arith.addf %42, %46 : vector<10x160xf32>
    %c2_52 = arith.constant 2 : index
    %c0_53 = arith.constant 0 : index
    %48 = vector.load %arg17[%c2_52, %c0_53] : memref<14x84xf32, #tpu.memory_space<vmem>>, vector<10x84xf32>
    %c2_54 = arith.constant 2 : index
    %c0_55 = arith.constant 0 : index
    %c0_56 = arith.constant 0 : index
    %49 = vector.load %arg6[%c2_54, %c0_55, %c0_56] : memref<5x84x160xf32, #tpu.memory_space<vmem>>, vector<1x84x160xf32>
    %50 = vector.shape_cast %49 : vector<1x84x160xf32> to vector<84x160xf32>
    %cst_57 = arith.constant dense<0.000000e+00> : vector<10x160xf32>
    %51 = tpu.matmul %48, %50, %cst_57 {dimension_numbers = #tpu.dot_dimension_numbers<[1], [0], [0], [1], [0, 0, 1, 1], [], []>} : vector<10x84xf32>, vector<84x160xf32>, vector<10x160xf32> -> vector<10x160xf32>
    %52 = arith.addf %47, %51 : vector<10x160xf32>
    %c3_58 = arith.constant 3 : index
    %c0_59 = arith.constant 0 : index
    %53 = vector.load %arg17[%c3_58, %c0_59] : memref<14x84xf32, #tpu.memory_space<vmem>>, vector<10x84xf32>
    %c3_60 = arith.constant 3 : index
    %c0_61 = arith.constant 0 : index
    %c0_62 = arith.constant 0 : index
    %54 = vector.load %arg6[%c3_60, %c0_61, %c0_62] : memref<5x84x160xf32, #tpu.memory_space<vmem>>, vector<1x84x160xf32>
    %55 = vector.shape_cast %54 : vector<1x84x160xf32> to vector<84x160xf32>
    %cst_63 = arith.constant dense<0.000000e+00> : vector<10x160xf32>
    %56 = tpu.matmul %53, %55, %cst_63 {dimension_numbers = #tpu.dot_dimension_numbers<[1], [0], [0], [1], [0, 0, 1, 1], [], []>} : vector<10x84xf32>, vector<84x160xf32>, vector<10x160xf32> -> vector<10x160xf32>
    %57 = arith.addf %52, %56 : vector<10x160xf32>
    %c4_64 = arith.constant 4 : index
    %c0_65 = arith.constant 0 : index
    %58 = vector.load %arg17[%c4_64, %c0_65] : memref<14x84xf32, #tpu.memory_space<vmem>>, vector<10x84xf32>
    %c4_66 = arith.constant 4 : index
    %c0_67 = arith.constant 0 : index
    %c0_68 = arith.constant 0 : index
    %59 = vector.load %arg6[%c4_66, %c0_67, %c0_68] : memref<5x84x160xf32, #tpu.memory_space<vmem>>, vector<1x84x160xf32>
    %60 = vector.shape_cast %59 : vector<1x84x160xf32> to vector<84x160xf32>
    %cst_69 = arith.constant dense<0.000000e+00> : vector<10x160xf32>
    %61 = tpu.matmul %58, %60, %cst_69 {dimension_numbers = #tpu.dot_dimension_numbers<[1], [0], [0], [1], [0, 0, 1, 1], [], []>} : vector<10x84xf32>, vector<84x160xf32>, vector<10x160xf32> -> vector<10x160xf32>
    %62 = arith.addf %57, %61 : vector<10x160xf32>
    %c0_70 = arith.constant 0 : index
    %c0_71 = arith.constant 0 : index
    %63 = vector.load %arg7[%c0_70, %c0_71] : memref<1x160xf32, #tpu.memory_space<vmem>>, vector<1x160xf32>
    %64 = vector.broadcast %63 : vector<1x160xf32> to vector<10x160xf32>
    %65 = arith.addf %62, %64 : vector<10x160xf32>
    %cst_72 = arith.constant 0.000000e+00 : f32
    %66 = vector.broadcast %cst_72 : f32 to vector<10x160xf32>
    %67 = arith.maximumf %65, %66 : vector<10x160xf32>
    %c0_73 = arith.constant 0 : index
    %c0_74 = arith.constant 0 : index
    %68 = vector.load %arg9[%c0_73, %c0_74] : memref<5x10xf32, #tpu.memory_space<vmem>>, vector<5x10xf32>
    %c0_75 = arith.constant 0 : index
    %c0_76 = arith.constant 0 : index
    %69 = vector.load %arg8[%c0_75, %c0_76] : memref<160x80xf32, #tpu.memory_space<vmem>>, vector<160x80xf32>
    %cst_77 = arith.constant dense<0.000000e+00> : vector<10x80xf32>
    %70 = tpu.matmul %67, %69, %cst_77 {dimension_numbers = #tpu.dot_dimension_numbers<[1], [0], [0], [1], [0, 0, 1, 1], [], []>} : vector<10x160xf32>, vector<160x80xf32>, vector<10x80xf32> -> vector<10x80xf32>
    %cst_78 = arith.constant dense<0.000000e+00> : vector<5x80xf32>
    %71 = tpu.matmul %68, %70, %cst_78 {dimension_numbers = #tpu.dot_dimension_numbers<[1], [0], [0], [1], [0, 0, 1, 1], [], []>} : vector<5x10xf32>, vector<10x80xf32>, vector<5x80xf32> -> vector<5x80xf32>
    %c0_79 = arith.constant 0 : index
    %c0_80 = arith.constant 0 : index
    %72 = vector.load %arg18[%c0_79, %c0_80] : memref<5x80xf32, #tpu.memory_space<vmem>>, vector<5x80xf32>
    tpu.vector_store %arg18[%c0_79, %c0_80], %71 {strides = array<i32>} : memref<5x80xf32, #tpu.memory_space<vmem>>, vector<5x80xf32>,
    %c0_81 = arith.constant 0 : index
    %c0_82 = arith.constant 0 : index
    %73 = vector.load %arg18[%c0_81, %c0_82] : memref<5x80xf32, #tpu.memory_space<vmem>>, vector<1x80xf32>
    %c0_83 = arith.constant 0 : index
    %c0_84 = arith.constant 0 : index
    %74 = vector.load %arg19[%c0_83, %c0_84] : memref<1x400xf32, #tpu.memory_space<vmem>>, vector<1x80xf32>
    tpu.vector_store %arg19[%c0_83, %c0_84], %73 {strides = array<i32>} : memref<1x400xf32, #tpu.memory_space<vmem>>, vector<1x80xf32>,
    %c1_85 = arith.constant 1 : index
    %c0_86 = arith.constant 0 : index
    %75 = vector.load %arg18[%c1_85, %c0_86] : memref<5x80xf32, #tpu.memory_space<vmem>>, vector<1x80xf32>
    %c0_87 = arith.constant 0 : index
    %c80 = arith.constant 80 : index
    %76 = vector.load %arg19[%c0_87, %c80] : memref<1x400xf32, #tpu.memory_space<vmem>>, vector<1x80xf32>
    tpu.vector_store %arg19[%c0_87, %c80], %75 {strides = array<i32>} : memref<1x400xf32, #tpu.memory_space<vmem>>, vector<1x80xf32>,
    %c2_88 = arith.constant 2 : index
    %c0_89 = arith.constant 0 : index
    %77 = vector.load %arg18[%c2_88, %c0_89] : memref<5x80xf32, #tpu.memory_space<vmem>>, vector<1x80xf32>
    %c0_90 = arith.constant 0 : index
    %c160 = arith.constant 160 : index
    %78 = vector.load %arg19[%c0_90, %c160] : memref<1x400xf32, #tpu.memory_space<vmem>>, vector<1x80xf32>
    tpu.vector_store %arg19[%c0_90, %c160], %77 {strides = array<i32>} : memref<1x400xf32, #tpu.memory_space<vmem>>, vector<1x80xf32>,
    %c3_91 = arith.constant 3 : index
    %c0_92 = arith.constant 0 : index
    %79 = vector.load %arg18[%c3_91, %c0_92] : memref<5x80xf32, #tpu.memory_space<vmem>>, vector<1x80xf32>
    %c0_93 = arith.constant 0 : index
    %c240 = arith.constant 240 : index
    %80 = vector.load %arg19[%c0_93, %c240] : memref<1x400xf32, #tpu.memory_space<vmem>>, vector<1x80xf32>
    tpu.vector_store %arg19[%c0_93, %c240], %79 {strides = array<i32>} : memref<1x400xf32, #tpu.memory_space<vmem>>, vector<1x80xf32>,
    %c4_94 = arith.constant 4 : index
    %c0_95 = arith.constant 0 : index
    %81 = vector.load %arg18[%c4_94, %c0_95] : memref<5x80xf32, #tpu.memory_space<vmem>>, vector<1x80xf32>
    %c0_96 = arith.constant 0 : index
    %c320 = arith.constant 320 : index
    %82 = vector.load %arg19[%c0_96, %c320] : memref<1x400xf32, #tpu.memory_space<vmem>>, vector<1x80xf32>
    tpu.vector_store %arg19[%c0_96, %c320], %81 {strides = array<i32>} : memref<1x400xf32, #tpu.memory_space<vmem>>, vector<1x80xf32>,
    %c0_97 = arith.constant 0 : index
    %c0_98 = arith.constant 0 : index
    %83 = vector.load %arg19[%c0_97, %c0_98] : memref<1x400xf32, #tpu.memory_space<vmem>>, vector<1x400xf32>
    %c0_99 = arith.constant 0 : index
    %c0_100 = arith.constant 0 : index
    %84 = vector.load %arg10[%c0_99, %c0_100] : memref<400x120xf32, #tpu.memory_space<vmem>>, vector<400x120xf32>
    %cst_101 = arith.constant dense<0.000000e+00> : vector<1x120xf32>
    %85 = tpu.matmul %83, %84, %cst_101 {dimension_numbers = #tpu.dot_dimension_numbers<[1], [0], [0], [1], [0, 0, 1, 1], [], []>} : vector<1x400xf32>, vector<400x120xf32>, vector<1x120xf32> -> vector<1x120xf32>
    %c0_102 = arith.constant 0 : index
    %c0_103 = arith.constant 0 : index
    %86 = vector.load %arg11[%c0_102, %c0_103] : memref<1x120xf32, #tpu.memory_space<vmem>>, vector<1x120xf32>
    %87 = arith.addf %85, %86 : vector<1x120xf32>
    %cst_104 = arith.constant 0.000000e+00 : f32
    %88 = vector.broadcast %cst_104 : f32 to vector<1x120xf32>
    %89 = arith.maximumf %87, %88 : vector<1x120xf32>
    %c0_105 = arith.constant 0 : index
    %c0_106 = arith.constant 0 : index
    %90 = vector.load %arg12[%c0_105, %c0_106] : memref<120x84xf32, #tpu.memory_space<vmem>>, vector<120x84xf32>
    %cst_107 = arith.constant dense<0.000000e+00> : vector<1x84xf32>
    %91 = tpu.matmul %89, %90, %cst_107 {dimension_numbers = #tpu.dot_dimension_numbers<[1], [0], [0], [1], [0, 0, 1, 1], [], []>} : vector<1x120xf32>, vector<120x84xf32>, vector<1x84xf32> -> vector<1x84xf32>
    %c0_108 = arith.constant 0 : index
    %c0_109 = arith.constant 0 : index
    %92 = vector.load %arg13[%c0_108, %c0_109] : memref<1x84xf32, #tpu.memory_space<vmem>>, vector<1x84xf32>
    %93 = arith.addf %91, %92 : vector<1x84xf32>
    %cst_110 = arith.constant 0.000000e+00 : f32
    %94 = vector.broadcast %cst_110 : f32 to vector<1x84xf32>
    %95 = arith.maximumf %93, %94 : vector<1x84xf32>
    %c0_111 = arith.constant 0 : index
    %c0_112 = arith.constant 0 : index
    %96 = vector.load %arg14[%c0_111, %c0_112] : memref<84x10xf32, #tpu.memory_space<vmem>>, vector<84x10xf32>
    %cst_113 = arith.constant dense<0.000000e+00> : vector<1x10xf32>
    %97 = tpu.matmul %95, %96, %cst_113 {dimension_numbers = #tpu.dot_dimension_numbers<[1], [0], [0], [1], [0, 0, 1, 1], [], []>} : vector<1x84xf32>, vector<84x10xf32>, vector<1x10xf32> -> vector<1x10xf32>
    %c0_114 = arith.constant 0 : index
    %c0_115 = arith.constant 0 : index
    %98 = vector.load %arg15[%c0_114, %c0_115] : memref<1x10xf32, #tpu.memory_space<vmem>>, vector<1x10xf32>
    %99 = arith.addf %97, %98 : vector<1x10xf32>
    %c0_116 = arith.constant 0 : index
    %c0_117 = arith.constant 0 : index
    %c0_118 = arith.constant 0 : index
    %100 = vector.load %arg16[%c0_116, %c0_117, %c0_118] : memref<1x1x10xf32, #tpu.memory_space<vmem>>, vector<1x1x10xf32>
    %101 = vector.shape_cast %100 : vector<1x1x10xf32> to vector<1x10xf32>
    %102 = vector.shape_cast %99 : vector<1x10xf32> to vector<1x1x10xf32>
    tpu.vector_store %arg16[%c0_116, %c0_117, %c0_118], %102 {strides = array<i32>} : memref<1x1x10xf32, #tpu.memory_space<vmem>>, vector<1x1x10xf32>,
    return
  }
  func.func @transform_0(%arg0: i32) -> (i32, i32, i32) {
    %c0_i32 = arith.constant 0 : i32
    %c0_i32_0 = arith.constant 0 : i32
    %c0_i32_1 = arith.constant 0 : i32
    return %arg0, %c0_i32, %c0_i32_0 : i32, i32, i32
  }
  func.func @transform_1(%arg0: i32) -> (i32, i32, i32) {
    %c0_i32 = arith.constant 0 : i32
    %c0_i32_0 = arith.constant 0 : i32
    %c0_i32_1 = arith.constant 0 : i32
    %c0_i32_2 = arith.constant 0 : i32
    return %c0_i32, %c0_i32_0, %c0_i32_1 : i32, i32, i32
  }
  func.func @transform_2(%arg0: i32) -> (i32, i32) {
    %c0_i32 = arith.constant 0 : i32
    %c0_i32_0 = arith.constant 0 : i32
    %c0_i32_1 = arith.constant 0 : i32
    return %c0_i32, %c0_i32_0 : i32, i32
  }
  func.func @transform_3(%arg0: i32) -> (i32, i32) {
    %c0_i32 = arith.constant 0 : i32
    %c0_i32_0 = arith.constant 0 : i32
    %c0_i32_1 = arith.constant 0 : i32
    return %c0_i32, %c0_i32_0 : i32, i32
  }
  func.func @transform_4(%arg0: i32) -> (i32, i32) {
    %c0_i32 = arith.constant 0 : i32
    %c0_i32_0 = arith.constant 0 : i32
    %c0_i32_1 = arith.constant 0 : i32
    return %c0_i32, %c0_i32_0 : i32, i32
  }
  func.func @transform_5(%arg0: i32) -> (i32, i32, i32) {
    %c0_i32 = arith.constant 0 : i32
    %c0_i32_0 = arith.constant 0 : i32
    %c0_i32_1 = arith.constant 0 : i32
    %c0_i32_2 = arith.constant 0 : i32
    return %c0_i32, %c0_i32_0, %c0_i32_1 : i32, i32, i32
  }
  func.func @transform_6(%arg0: i32) -> (i32, i32) {
    %c0_i32 = arith.constant 0 : i32
    %c0_i32_0 = arith.constant 0 : i32
    %c0_i32_1 = arith.constant 0 : i32
    return %c0_i32, %c0_i32_0 : i32, i32
  }
  func.func @transform_7(%arg0: i32) -> (i32, i32) {
    %c0_i32 = arith.constant 0 : i32
    %c0_i32_0 = arith.constant 0 : i32
    %c0_i32_1 = arith.constant 0 : i32
    return %c0_i32, %c0_i32_0 : i32, i32
  }
  func.func @transform_8(%arg0: i32) -> (i32, i32) {
    %c0_i32 = arith.constant 0 : i32
    %c0_i32_0 = arith.constant 0 : i32
    %c0_i32_1 = arith.constant 0 : i32
    return %c0_i32, %c0_i32_0 : i32, i32
  }
  func.func @transform_9(%arg0: i32) -> (i32, i32) {
    %c0_i32 = arith.constant 0 : i32
    %c0_i32_0 = arith.constant 0 : i32
    %c0_i32_1 = arith.constant 0 : i32
    return %c0_i32, %c0_i32_0 : i32, i32
  }
  func.func @transform_10(%arg0: i32) -> (i32, i32) {
    %c0_i32 = arith.constant 0 : i32
    %c0_i32_0 = arith.constant 0 : i32
    %c0_i32_1 = arith.constant 0 : i32
    return %c0_i32, %c0_i32_0 : i32, i32
  }
  func.func @transform_11(%arg0: i32) -> (i32, i32) {
    %c0_i32 = arith.constant 0 : i32
    %c0_i32_0 = arith.constant 0 : i32
    %c0_i32_1 = arith.constant 0 : i32
    return %c0_i32, %c0_i32_0 : i32, i32
  }
  func.func @transform_12(%arg0: i32) -> (i32, i32) {
    %c0_i32 = arith.constant 0 : i32
    %c0_i32_0 = arith.constant 0 : i32
    %c0_i32_1 = arith.constant 0 : i32
    return %c0_i32, %c0_i32_0 : i32, i32
  }
  func.func @transform_13(%arg0: i32) -> (i32, i32) {
    %c0_i32 = arith.constant 0 : i32
    %c0_i32_0 = arith.constant 0 : i32
    %c0_i32_1 = arith.constant 0 : i32
    return %c0_i32, %c0_i32_0 : i32, i32
  }
  func.func @transform_14(%arg0: i32) -> (i32, i32) {
    %c0_i32 = arith.constant 0 : i32
    %c0_i32_0 = arith.constant 0 : i32
    %c0_i32_1 = arith.constant 0 : i32
    return %c0_i32, %c0_i32_0 : i32, i32
  }
  func.func @transform_15(%arg0: i32) -> (i32, i32, i32) {
    %c0_i32 = arith.constant 0 : i32
    %c0_i32_0 = arith.constant 0 : i32
    %c0_i32_1 = arith.constant 0 : i32
    return %arg0, %c0_i32, %c0_i32_0 : i32, i32, i32
  }
}

</mosaic_0001>

<bundles_post_ra>
// kernel: tile.13
= control target key start
LH: loop header
LB: loop body
LE: loop exit
PB: predicated region body
PF: predicated region fallthrough
CT: control target
= control target key end

     0   :  { %s40_s0 = inlined_call_operand.vmem [shape: f32[6], index: 0, kind: input, shape index: {}]   ;;  %s41_s1 = inlined_call_operand.vmem [shape: f32[28,6], index: 1, kind: output, shape index: {}]  }
   0x1   :  { %v4_v0 = vld [vmem:[%s40_s0] ss:$0 sm:$0xff] }
   0x2   :  { %5 = vst [vmem:[%s41_s1] sm:$0xff] %v4_v0  ;;  %12 = vst [vmem:[%s41_s1 + $0x8] sm:$0xff] %v4_v0 }
   0x3   :  { %13 = vst [vmem:[%s41_s1 + $0x10] sm:$0xff] %v4_v0  ;;  %14 = vst [vmem:[%s41_s1 + $0x18] sm:$0xff] %v4_v0 }

// kernel: tile.14
= control target key start
LH: loop header
LB: loop body
LE: loop exit
PB: predicated region body
PF: predicated region fallthrough
CT: control target
= control target key end

     0   :  { %vm9_vm0 = vcmask 15360   ;;  %s247_s12 = smov 126   ;;  %s248_s13 = smov 114   ;;  %vm3_vm1 = vcmask 48128   ;;  %vm13_vm2 = vcmask 31744   ;;  %vm16_vm3 = vcmask 1048560   ;;  %s377_s0 = inlined_call_operand.vmem [shape: f32[28,6], index: 0, kind: input, shape index: {}]   ;;  %s378_s1 = inlined_call_operand.vmem [shape: f32[1,168], index: 1, kind: output, shape index: {}]  }
   0x1   :  { %v191_v0 = vld [vmem:[%s377_s0 + $0x15] sm:$0x1]   ;;  %v194_v3 = vld [vmem:[%s377_s0 + $0x13] sm:$0x1]   ;;  %v193_v4 = vld [vmem:[%s377_s0 + $0x14] sm:$0x1]  }
   0x2   :  { %v192_v1 = vld [vmem:[%s377_s0 + $0x15] sm:$0x1]   ;;  %26 = vrot.lane.b32.xlu1 %v194_v3, %s248_s13  ;;  %v195_v5 = vld [vmem:[%s377_s0 + $0x12] sm:$0x1]   ;;  %s249_s18 = smov 120   ;;  %s250_s19 = smov 108  }
   0x3   :  { %v10_v2 = vsel %vm9_vm0, %v192_v1, %v191_v0  ;;  %v196_v6 = vld [vmem:[%s377_s0 + $0x11] sm:$0x1]   ;;  %v197_v7 = vld [vmem:[%s377_s0 + $0x10] sm:$0x1]   ;;  %s251_s24 = smov 102   ;;  %s252_s25 = smov 96  }
   0x4   :  { %11 = vrot.lane.b32.xlu0 %v10_v2, %s247_s12  ;;  %v198_v8 = vld [vmem:[%s377_s0 + $0xf] sm:$0x1]   ;;  %v199_v9 = vld [vmem:[%s377_s0 + $0xe] sm:$0x1]   ;;  %s253_s30 = smov 90   ;;  %s254_s2 = smov 84  }
   0x5   :  { %v2_v10 = vld [vmem:[%s377_s0] sm:$0x1]   ;;  %v200_v11 = vld [vmem:[%s377_s0 + $0xd] sm:$0x1]   ;;  %v201_v12 = vld [vmem:[%s377_s0 + $0xc] sm:$0x1]  }
   0x6   :  { %32 = vrot.lane.b32.xlu1 %v195_v5, %s250_s19  ;;  %4 = vst.msk [vmem:[#allocation0] sm:$0x1] %vm3_vm1, %v2_v10   ;;  %s255_s9 = smov 78   ;;  %s256_s10 = smov 72   ;;  %v202_v13 = vld [vmem:[%s377_s0 + $0xb] sm:$0x1]  }
   0x7   :  { %v203_v14 = vld [vmem:[%s377_s0 + $0xa] sm:$0x1]   ;;  %s257_s15 = smov 66   ;;  %s258_s16 = smov 60   ;;  %v204_v15 = vld [vmem:[%s377_s0 + $0x9] sm:$0x1]  }
   0x8   :  { %20 = vrot.lane.b32.xlu0 %v193_v4, %s249_s18  ;;  %v205_v16 = vld [vmem:[%s377_s0 + $0x8] sm:$0x1]   ;;  %s259_s21 = smov 54   ;;  %s260_s22 = smov 48   ;;  %v206_v17 = vld [vmem:[%s377_s0 + $0x7] sm:$0x1]  }
   0x9   :  { %v207_v18 = vld [vmem:[%s377_s0 + $0x6] sm:$0x1]   ;;  %s261_s27 = smov 42   ;;  %s262_s28 = smov 36   ;;  %v208_v19 = vld [vmem:[%s377_s0 + $0x1b] sm:$0x1]  }
   0xa   :  { %44 = vrot.lane.b32.xlu1 %v197_v7, %s252_s25  ;;  %v209_v20 = vld [vmem:[%s377_s0 + $0x5] sm:$0x1]   ;;  %s263_s4 = smov 34   ;;  %s264_s5 = smov 30   ;;  %v210_v21 = vld [vmem:[%s377_s0 + $0x1a] sm:$0x1]  }
   0xb   :  { %v211_v22 = vld [vmem:[%s377_s0 + $0x4] sm:$0x1]   ;;  %s266_s11 = smov 24   ;;  %v212_v23 = vld [vmem:[%s377_s0 + $0x19] sm:$0x1]   ;;  %s268_s17 = smov 18  }
   0xc   :  { %38 = vrot.lane.b32.xlu0 %v196_v6, %s251_s24  ;;  %v213_v24 = vld [vmem:[%s377_s0 + $0x3] sm:$0x1]   ;;  %v214_v25 = vld [vmem:[%s377_s0 + $0x18] sm:$0x1]   ;;  %v215_v26 = vld [vmem:[%s377_s0 + $0x2] sm:$0x1]  }
   0xd   :  { %s270_s23 = smov 12   ;;  %v216_v27 = vld [vmem:[%s377_s0 + $0x17] sm:$0x1]   ;;  %v217_v28 = vld [vmem:[%s377_s0 + $0x1] sm:$0x1]   ;;  %s272_s29 = smov 6  }
   0xe   :  { %56 = vrot.lane.b32.xlu1 %v199_v9, %s254_s2  ;;  %v218_v29 = vld [vmem:[%s377_s0 + $0x16] sm:$0x1]   ;;  %s273_s0 = smov 4   ;;  %vm22_vm4 = vcmask 1032128   ;;  %vm28_vm5 = vcmask 982928   ;;  %vm34_vm6 = vcmask 933728  }
   0xf   :  { %vm40_vm7 = vcmask 884528   ;;  %vm46_vm8 = vcmask 835328   ;;  %vm52_vm9 = vcmask 786128   ;;  %vm58_vm10 = vcmask 736928  }
  0x10   :  { %50 = vrot.lane.b32.xlu0 %v198_v8, %s253_s30  ;;  %vm64_vm11 = vcmask 687728   ;;  %vm70_vm12 = vcmask 638528   ;;  %vm76_vm13 = vcmask 589328   ;;  %vm82_vm14 = vcmask 540128  }
  0x11   :  { %vm88_vm15 = vcmask 490928   ;;  %vm94_vm0 = vcmask 441728   ;;  %vm100_vm1 = vcmask 392528  }
  0x12   :  { %68 = vrot.lane.b32.xlu1 %v201_v12, %s256_s10  ;;  %s265_s10 = smov 28  }
  0x14   :  { %62 = vrot.lane.b32.xlu0 %v200_v11, %s255_s9 }
  0x16   :  { %80 = vrot.lane.b32.xlu1 %v203_v14, %s258_s16  ;;  %s267_s16 = smov 22  }
  0x18   :  { %74 = vrot.lane.b32.xlu0 %v202_v13, %s257_s15 }
  0x1a   :  { %92 = vrot.lane.b32.xlu1 %v205_v16, %s260_s22  ;;  %s269_s22 = smov 16  }
  0x1c   :  { %86 = vrot.lane.b32.xlu0 %v204_v15, %s259_s21 }
  0x1e   :  { %104 = vrot.lane.b32.xlu1 %v207_v18, %s262_s28  ;;  %s271_s28 = smov 10  }
  0x20   :  { %98 = vrot.lane.b32.xlu0 %v206_v17, %s261_s27 }
  0x22   :  { %117 = vrot.lane.b32.xlu1 %v209_v20, %s264_s5 }
  0x24   :  { %110 = vrot.lane.b32.xlu0 %v208_v19, %s263_s4 }
  0x26   :  { %130 = vrot.lane.b32.xlu1 %v211_v22, %s266_s11 }
  0x28   :  { %123 = vrot.lane.b32.xlu0 %v210_v21, %s265_s10 }
  0x2a   :  { %143 = vrot.lane.b32.xlu1 %v213_v24, %s268_s17 }
  0x2c   :  { %136 = vrot.lane.b32.xlu0 %v212_v23, %s267_s16 }
  0x2e   :  { %156 = vrot.lane.b32.xlu1 %v215_v26, %s270_s23 }
  0x30   :  { %149 = vrot.lane.b32.xlu0 %v214_v25, %s269_s22 }
  0x32   :  { %169 = vrot.lane.b32.xlu1 %v217_v28, %s272_s29 }
  0x34   :  { %162 = vrot.lane.b32.xlu0 %v216_v27, %s271_s28 }
  0x38   :  { %175 = vrot.lane.b32.xlu0 %v218_v29, %s273_s0 }
  0x74   :  { %v27_v31 = vpop.permute.xlu1 %26  }
  0x76   :  { %v12_v30 = vpop.permute.xlu0 %11  }
  0x77   :  { %15 = vst.msk [vmem:[#allocation0 + $0x8] sm:$0x1] %vm13_vm2, %v12_v30   ;;  %vm106_vm2 = vcmask 343328  }
  0x78   :  { %17 = vst.msk [vmem:[#allocation0] sm:$0x1] %vm16_vm3, %v12_v30   ;;  %v33_v33 = vpop.permute.xlu1 %32   ;;  %vm112_vm3 = vcmask 326928  }
  0x7a   :  { %v21_v32 = vpop.permute.xlu0 %20  }
  0x7b   :  { %23 = vst.msk [vmem:[#allocation0] sm:$0x1] %vm22_vm4, %v21_v32   ;;  %vm119_vm4 = vcmask 294128  }
  0x7c   :  { %29 = vst.msk [vmem:[#allocation0] sm:$0x1] %vm28_vm5, %v27_v31   ;;  %v45_v35 = vpop.permute.xlu1 %44   ;;  %vm125_vm5 = vcmask 277728  }
  0x7d   :  { %35 = vst.msk [vmem:[#allocation0] sm:$0x1] %vm34_vm6, %v33_v33   ;;  %vm132_vm6 = vcmask 244928  }
  0x7e   :  { %v39_v34 = vpop.permute.xlu0 %38  }
  0x7f   :  { %41 = vst.msk [vmem:[#allocation0] sm:$0x1] %vm40_vm7, %v39_v34   ;;  %vm138_vm7 = vcmask 228528  }
  0x80   :  { %47 = vst.msk [vmem:[#allocation0] sm:$0x1] %vm46_vm8, %v45_v35   ;;  %v57_v37 = vpop.permute.xlu1 %56   ;;  %vm145_vm8 = vcmask 195728  }
  0x82   :  { %v51_v36 = vpop.permute.xlu0 %50  }
  0x83   :  { %53 = vst.msk [vmem:[#allocation0] sm:$0x1] %vm52_vm9, %v51_v36   ;;  %vm151_vm9 = vcmask 179328  }
  0x84   :  { %59 = vst.msk [vmem:[#allocation0] sm:$0x1] %vm58_vm10, %v57_v37   ;;  %v69_v39 = vpop.permute.xlu1 %68   ;;  %vm158_vm10 = vcmask 146528  }
  0x86   :  { %v63_v38 = vpop.permute.xlu0 %62  }
  0x87   :  { %65 = vst.msk [vmem:[#allocation0] sm:$0x1] %vm64_vm11, %v63_v38   ;;  %vm164_vm11 = vcmask 130128  }
  0x88   :  { %71 = vst.msk [vmem:[#allocation0] sm:$0x1] %vm70_vm12, %v69_v39   ;;  %v81_v41 = vpop.permute.xlu1 %80   ;;  %vm171_vm12 = vcmask 97328  }
  0x8a   :  { %v75_v40 = vpop.permute.xlu0 %74  }
  0x8b   :  { %77 = vst.msk [vmem:[#allocation0] sm:$0x1] %vm76_vm13, %v75_v40   ;;  %vm177_vm13 = vcmask 80928  }
  0x8c   :  { %83 = vst.msk [vmem:[#allocation0] sm:$0x1] %vm82_vm14, %v81_v41   ;;  %v93_v43 = vpop.permute.xlu1 %92  }
  0x8e   :  { %v87_v42 = vpop.permute.xlu0 %86  }
  0x8f   :  { %89 = vst.msk [vmem:[#allocation0] sm:$0x1] %vm88_vm15, %v87_v42  }
  0x90   :  { %95 = vst.msk [vmem:[#allocation0] sm:$0x1] %vm94_vm0, %v93_v43   ;;  %v105_v45 = vpop.permute.xlu1 %104  }
  0x92   :  { %v99_v44 = vpop.permute.xlu0 %98  }
  0x93   :  { %101 = vst.msk [vmem:[#allocation0] sm:$0x1] %vm100_vm1, %v99_v44  }
  0x94   :  { %107 = vst.msk [vmem:[#allocation0] sm:$0x1] %vm106_vm2, %v105_v45   ;;  %v118_v47 = vpop.permute.xlu1 %117  }
  0x95   :  { %120 = vst.msk [vmem:[#allocation0] sm:$0x1] %vm119_vm4, %v118_v47  }
  0x96   :  { %v111_v46 = vpop.permute.xlu0 %110  }
  0x97   :  { %114 = vst.msk [vmem:[#allocation0 + $0x8] sm:$0x1] %vm112_vm3, %v111_v46  }
  0x98   :  { %v131_v49 = vpop.permute.xlu1 %130  }
  0x99   :  { %133 = vst.msk [vmem:[#allocation0] sm:$0x1] %vm132_vm6, %v131_v49  }
  0x9a   :  { %v124_v48 = vpop.permute.xlu0 %123  }
  0x9b   :  { %127 = vst.msk [vmem:[#allocation0 + $0x8] sm:$0x1] %vm125_vm5, %v124_v48  }
  0x9c   :  { %v144_v51 = vpop.permute.xlu1 %143  }
  0x9d   :  { %146 = vst.msk [vmem:[#allocation0] sm:$0x1] %vm145_vm8, %v144_v51  }
  0x9e   :  { %v137_v50 = vpop.permute.xlu0 %136  }
  0x9f   :  { %140 = vst.msk [vmem:[#allocation0 + $0x8] sm:$0x1] %vm138_vm7, %v137_v50  }
  0xa0   :  { %v157_v53 = vpop.permute.xlu1 %156  }
  0xa1   :  { %159 = vst.msk [vmem:[#allocation0] sm:$0x1] %vm158_vm10, %v157_v53  }
  0xa2   :  { %v150_v52 = vpop.permute.xlu0 %149  }
  0xa3   :  { %153 = vst.msk [vmem:[#allocation0 + $0x8] sm:$0x1] %vm151_vm9, %v150_v52  }
  0xa4   :  { %v170_v55 = vpop.permute.xlu1 %169  }
  0xa5   :  { %172 = vst.msk [vmem:[#allocation0] sm:$0x1] %vm171_vm12, %v170_v55  }
  0xa6   :  { %v163_v54 = vpop.permute.xlu0 %162  }
  0xa7   :  { %166 = vst.msk [vmem:[#allocation0 + $0x8] sm:$0x1] %vm164_vm11, %v163_v54  }
  0xaa   :  { %v176_v56 = vpop.permute.xlu0 %175  }
  0xab   :  { %179 = vst.msk [vmem:[#allocation0 + $0x8] sm:$0x1] %vm177_vm13, %v176_v56  }
  0xac   :  { %v183_v57 = vld [vmem:[#allocation0] sm:$0x1] }
  0xad   :  { %185 = vst [vmem:[%s378_s1] sm:$0x1] %v183_v57 }
  0xb2   :  { %v187_v58 = vld [vmem:[#allocation0 + $0x8] sm:$0x1] }
  0xb3   :  { %219 = vst [vmem:[%s378_s1 + $0x1] sm:$0x1] %v187_v58 }

// kernel: tile.18
= control target key start
LH: loop header
LB: loop body
LE: loop exit
PB: predicated region body
PF: predicated region fallthrough
CT: control target
= control target key end

     0   :  { %s28_s0 = inlined_call_operand.vmem [shape: f32[16], index: 0, kind: input, shape index: {}]   ;;  %s29_s1 = inlined_call_operand.vmem [shape: f32[10,16], index: 1, kind: output, shape index: {}]  }
   0x1   :  { %v4_v0 = vld [vmem:[%s28_s0] ss:$0 sm:$0xff] }
   0x2   :  { %5 = vst [vmem:[%s29_s1] sm:$0xff] %v4_v0  ;;  %8 = vst [vmem:[%s29_s1 + $0x8] sm:$0xff] %v4_v0 }

// kernel: tile.19
= control target key start
LH: loop header
LB: loop body
LE: loop exit
PB: predicated region body
PF: predicated region fallthrough
CT: control target
= control target key end

     0   :  { %s75_s10 = smov 112   ;;  %s76_s11 = smov 80   ;;  %vm4_vm0 = vcmask 130048   ;;  %vm10_vm1 = vcmask 1048448   ;;  %vm16_vm2 = vcmask 917248   ;;  %vm22_vm3 = vcmask 786048   ;;  %s122_s0 = inlined_call_operand.vmem [shape: f32[10,16], index: 0, kind: input, shape index: {}]   ;;  %s123_s1 = inlined_call_operand.vmem [shape: f32[1,160], index: 1, kind: output, shape index: {}]  }
   0x1   :  { %v60_v0 = vld [vmem:[%s122_s0 + $0x7] sm:$0x1]   ;;  %v62_v1 = vld [vmem:[%s122_s0 + $0x5] sm:$0x1]   ;;  %v61_v2 = vld [vmem:[%s122_s0 + $0x6] sm:$0x1]  }
   0x2   :  { %8 = vrot.lane.b32.xlu0 %v60_v0, %s75_s10  ;;  %20 = vrot.lane.b32.xlu1 %v62_v1, %s76_s11  ;;  %v63_v3 = vld [vmem:[%s122_s0 + $0x4] sm:$0x1]   ;;  %s2_s16 = smov 3  ;;  %s77_s17 = smov 96   ;;  %v64_v5 = vld [vmem:[%s122_s0 + $0x3] sm:$0x1]  }
   0x3   :  { %s78_s18 = smov 64   ;;  %v3_v4 = vld [vmem:[%s122_s0] ss:$8 sm:%s2_s16]   ;;  %v65_v6 = vld [vmem:[%s122_s0 + $0x2] sm:$0x1]   ;;  %s43_s25 = smov 3 }
   0x4   :  { %5 = vst.msk [vmem:[#allocation0] ss:$8 sm:$0x3] %vm4_vm0, %v3_v4   ;;  %s79_s26 = smov 48   ;;  %s80_s27 = smov 32   ;;  %vm28_vm4 = vcmask 654848  }
   0x5   :  { %v66_v7 = vld [vmem:[%s122_s0 + $0x1] ss:$8 sm:%s43_s25]   ;;  %s81_s0 = smov 16   ;;  %vm34_vm5 = vcmask 523648   ;;  %vm40_vm6 = vcmask 392448   ;;  %vm47_vm7 = vcmask 261248  }
   0x6   :  { %14 = vrot.lane.b32.xlu0 %v61_v2, %s77_s17  ;;  %26 = vrot.lane.b32.xlu1 %v63_v3, %s78_s18 }
   0xa   :  { %32 = vrot.lane.b32.xlu0 %v64_v5, %s79_s26  ;;  %38 = vrot.lane.b32.xlu1 %v65_v6, %s80_s27 }
   0xe   :  { %45 = vrot.lane.b32.xlu0 %v66_v7, %s81_s0 }
  0x74   :  { %v9_v8 = vpop.permute.xlu0 %8   ;;  %v21_v9 = vpop.permute.xlu1 %20  }
  0x75   :  { %11 = vst.msk [vmem:[#allocation0] sm:$0x1] %vm10_vm1, %v9_v8  }
  0x78   :  { %v15_v10 = vpop.permute.xlu0 %14   ;;  %v27_v11 = vpop.permute.xlu1 %26  }
  0x79   :  { %17 = vst.msk [vmem:[#allocation0] sm:$0x1] %vm16_vm2, %v15_v10  }
  0x7a   :  { %23 = vst.msk [vmem:[#allocation0] sm:$0x1] %vm22_vm3, %v21_v9  }
  0x7b   :  { %29 = vst.msk [vmem:[#allocation0] sm:$0x1] %vm28_vm4, %v27_v11  }
  0x7c   :  { %v33_v12 = vpop.permute.xlu0 %32   ;;  %v39_v13 = vpop.permute.xlu1 %38  }
  0x7d   :  { %35 = vst.msk [vmem:[#allocation0] sm:$0x1] %vm34_vm5, %v33_v12  }
  0x7e   :  { %41 = vst.msk [vmem:[#allocation0] sm:$0x1] %vm40_vm6, %v39_v13  }
  0x80   :  { %v46_v14 = vpop.permute.xlu0 %45  }
  0x81   :  { %48 = vst.msk [vmem:[#allocation0] ss:$8 sm:$0x3] %vm47_vm7, %v46_v14  }
  0x88   :  { %v52_v15 = vld [vmem:[#allocation0] sm:$0x1]  ;;  %v56_v16 = vld [vmem:[#allocation0 + $0x8] sm:$0x1] }
  0x89   :  { %54 = vst [vmem:[%s123_s1] sm:$0x1] %v52_v15  ;;  %67 = vst [vmem:[%s123_s1 + $0x1] sm:$0x1] %v56_v16 }

// kernel: lenet5_forward.1
= control target key start
LH: loop header
LB: loop body
LE: loop exit
PB: predicated region body
PF: predicated region fallthrough
CT: control target
= control target key end

     0   :  { %s5190_s0 = inlined_call_operand.vmem [shape: f32[2,32,96], index: 0, kind: input, shape index: {}]   ;;  %s5191_s1 = inlined_call_operand.vmem [shape: f32[5,96,168], index: 1, kind: input, shape index: {}]   ;;  %s5192_s2 = inlined_call_operand.vmem [shape: f32[1,168], index: 2, kind: input, shape index: {}]   ;;  %s5193_s3 = inlined_call_operand.vmem [shape: f32[168,84], index: 3, kind: input, shape index: {}]   ;;  %s5194_s4 = inlined_call_operand.vmem [shape: f32[14,28], index: 4, kind: input, shape index: {}]   ;;  %s5195_s5 = inlined_call_operand.vmem [shape: f32[5,84,160], index: 5, kind: input, shape index: {}]   ;;  %s5196_s6 = inlined_call_operand.vmem [shape: f32[1,160], index: 6, kind: input, shape index: {}]   ;;  %s5197_s7 = inlined_call_operand.vmem [shape: f32[160,80], index: 7, kind: input, shape index: {}]   ;;  %s5198_s8 = inlined_call_operand.vmem [shape: f32[5,10], index: 8, kind: input, shape index: {}]   ;;  %s5199_s9 = inlined_call_operand.vmem [shape: f32[400,120], index: 9, kind: input, shape index: {}]   ;;  %s5200_s10 = inlined_call_operand.vmem [shape: f32[1,120], index: 10, kind: input, shape index: {}]   ;;  %s5201_s11 = inlined_call_operand.vmem [shape: f32[120,84], index: 11, kind: input, shape index: {}]   ;;  %s5202_s12 = inlined_call_operand.vmem [shape: f32[1,84], index: 12, kind: input, shape index: {}]   ;;  %s5203_s13 = inlined_call_operand.vmem [shape: f32[84,10], index: 13, kind: input, shape index: {}]   ;;  %s5204_s14 = inlined_call_operand.vmem [shape: f32[1,10], index: 14, kind: input, shape index: {}]   ;;  %s5205_s15 = inlined_call_operand.hbm [shape: f32[2,1,10], index: 15, kind: output, shape index: {}]  }
   0x1   :  { %5212 = sst [smem:[#allocation14_spill]] %s5190_s0 }
   0x2   :  { %20 = vsyncpa [#allocation6], 0 }
   0x3   :  { %22 = vsyncpa [#allocation6 + $0x1], 0  ;;  %s3801_s18 = smov 0   ;;  %s3803_s19 = smov 0  }
   0x4   :  { %s3805_s20 = smov 0   ;;  %s3807_s21 = smov 0  }
   0x5 LB: > { %5213 = sst [smem:[#allocation8_spill]] %s3697_s18  ;;  %s3822_s22 = sadd.s32 4294967295, %s3709_s21   ;;  %s3709_s21 = sphi %s3807_s21, %s5239_s21   ;;  %s3705_s20 = sphi %s3805_s20, %s5241_s20   ;;  %s3701_s19 = sphi %s3803_s19, %s5243_s19   ;;  %s3697_s18 = sphi %s3801_s18, %s5242_s18  }
   0x6   : > { %5214 = sst [smem:[#allocation9_spill]] %s3705_s20  ;;  %s2761_s23 = sadd.s32 4294967294, %s3709_s21  }
   0x7   : > { %5215 = sst [smem:[#allocation10_spill]] %s3709_s21  ;;  %s3826_s24 = sadd.s32 1, %s3709_s21  }
   0x8   : > { %5216 = sst [smem:[#allocation11_spill]] %s3826_s24  ;;  %s355_s25 = sadd.s32 1, %s3705_s20 }
   0x9   : > { %s352_s26 = ssub.s32 %s3709_s21, %s3826_s24  ;;  %p365_p0 = scmp.ne.s32.totalorder %s3705_s20, %s3701_s19 }
   0xa   : > { %p353_p1 = scmp.eq.s32.totalorder %s352_s26, 0  ;;  %p366_p2 = scmp.eq.s32.totalorder %s3822_s22, 1 }
   0xb   : > { %p371_p3 = scmp.ne.s32.totalorder %s3701_s19, %s3697_s18  ;;  %p372_p4 = scmp.eq.s32.totalorder %s2761_s23, 1 }
   0xc   : > { %s3837_s27 = scalar_select %p353_p1, %s3705_s20, %s355_s25  }
   0xd   : > { %p3839_p5 = por %p366_p2, %p365_p0  ;;  %p3843_p6 = por %p372_p4, %p371_p3 }
   0xe   : > { %5217 = sst [smem:[#allocation12_spill]] %s3837_s27  ;;  %p2764_p7 = scmp.ge.s32.totalorder %s3709_s21, 1 }
   0xf   : > { %s5219_s29 = scalar_select %p3843_p6, 1, 0 }
  0x10   : > { %p440_p8 = scmp.lt.s32.totalorder %s3709_s21, 3 }
  0x11   : > { %5220 = sst [smem:[#allocation13_spill]] %s5219_s29 }
  0x12   : > { %p441_p9 = pnand %p2764_p7, %p440_p8 }
  0x13   : > { %v2768_v0 = vld [vmem:[%s5191_s1 + $0xc8] sm:$0xff] (!%p441_p9)  ;;  %v2770_v1 = vld [vmem:[%s5191_s1 + $0xd8] sm:$0xff] (!%p441_p9)  ;;  %v2767_v2 = vld [vmem:[%s5191_s1 + $0xc0] sm:$0xff] (!%p441_p9)  ;;  %v3711_v7 = vmov (!%p441_p9), 0.0   ;;  %v3712_v21 = vmov (!%p441_p9), 0.0|0.0   ;;  %p487_p10 = scmp.lt.s32.totalorder (!%p441_p9), %s3822_s22, 1 }
  0x14   : > { %444 = sbr.rel (%p441_p9) target bundleno = 2359 (0x937), region = 80  ;;  %v3162_v3 = vpack.c.bf16 (!%p441_p9), %v2770_v1, %v2768_v0  ;;  %v2769_v4 = vld [vmem:[%s5191_s1 + $0xd0] sm:$0xff] (!%p441_p9)  ;;  %v2772_v5 = vld [vmem:[%s5191_s1 + $0xe8] sm:$0xff] (!%p441_p9)  ;;  %v2774_v6 = vld [vmem:[%s5191_s1 + $0xf8] sm:$0xff] (!%p441_p9)  ;;  %626 = vmatprep.mubr.f32.mxu0 (!%p441_p9), %v3711_v7  ;;  %3282 = vmatprep.subr.bf16.mxu1 (!%p441_p9), %v3712_v21  ;;  %s5221_s0 = sld [smem:[#allocation14_spill]] (!%p441_p9)  ;;  %vm549_vm0 = vcmask (!%p441_p9), 785408  }
  0x15   : > { %v3164_v8 = vpack.c.bf16 (!%p441_p9), %v2769_v4, %v2767_v2  ;;  %v3166_v9 = vpack.c.bf16 (!%p441_p9), %v2774_v6, %v2772_v5  ;;  %v2771_v10 = vld [vmem:[%s5191_s1 + $0xe0] sm:$0xff] (!%p441_p9)  ;;  %v2773_v11 = vld [vmem:[%s5191_s1 + $0xf0] sm:$0xff] (!%p441_p9)  ;;  %v2776_v12 = vld [vmem:[%s5191_s1 + $0x108] sm:$0xff] (!%p441_p9)  ;;  %vm1217_vm1 = vcmask (!%p441_p9), 326656   ;;  %vm1315_vm2 = vcmask (!%p441_p9), 228352   ;;  %s3717_s21 = smov (!%p441_p9), 64  }
  0x16   : > { %3163 = vmatprep.subr.bf16.mxu0 (!%p441_p9), %v3162_v3  ;;  %v2778_v13 = vld [vmem:[%s5191_s1 + $0x118] sm:$0xff] (!%p441_p9)  ;;  %v3168_v14 = vpack.c.bf16 (!%p441_p9), %v2773_v11, %v2771_v10  ;;  %v2775_v16 = vld [vmem:[%s5191_s1 + $0x100] sm:$0xff] (!%p441_p9)  ;;  %v2777_v17 = vld [vmem:[%s5191_s1 + $0x110] sm:$0xff] (!%p441_p9)  ;;  %vm1322_vm3 = vcmask (!%p441_p9), 1043456   ;;  %vm3713_vm4 = vmmov (!%p441_p9), 1   ;;  %vm1403_vm6 = vcmask (!%p441_p9), 685056  }
  0x17   : > { %3165 = vmatpush1.bf16.msra.mxu0 (!%p441_p9), %v3164_v8  ;;  %v3170_v15 = vpack.c.bf16 (!%p441_p9), %v2778_v13, %v2776_v12  ;;  %v2780_v18 = vld [vmem:[%s5191_s1 + $0x128] sm:$0xff] (!%p441_p9)  ;;  %v2782_v19 = vld [vmem:[%s5191_s1 + $0x138] sm:$0xff] (!%p441_p9)  ;;  %v3172_v20 = vpack.c.bf16 (!%p441_p9), %v2777_v17, %v2775_v16  ;;  %v2779_v23 = vld [vmem:[%s5191_s1 + $0x120] sm:$0xff] (!%p441_p9)  ;;  %vm1401_vm7 = vcmask (!%p441_p9), 687104   ;;  %vm2027_vm8 = vcmask (!%p441_p9), 261120   ;;  %s3718_s20 = smov (!%p441_p9), 112  }
  0x18   : > { %3167 = vmatprep.subr.bf16.mxu0 (!%p441_p9), %v3166_v9  ;;  %v3174_v22 = vpack.c.bf16 (!%p441_p9), %v2782_v19, %v2780_v18  ;;  %v2781_v24 = vld [vmem:[%s5191_s1 + $0x130] sm:$0xff] (!%p441_p9)  ;;  %v2784_v25 = vld [vmem:[%s5191_s1 + $0x148] sm:$0xff] (!%p441_p9)  ;;  %v2786_v26 = vld [vmem:[%s5191_s1 + $0x158] sm:$0xff] (!%p441_p9)  ;;  %vm3714_vm9 = vmmov (!%p441_p9), 0   ;;  %vm2113_vm10 = vcmask (!%p441_p9), 1041408   ;;  %vm2109_vm12 = vcmask (!%p441_p9), 80896  }
  0x19   : > { %v3176_v27 = vpack.c.bf16 (!%p441_p9), %v2781_v24, %v2779_v23  ;;  %v3178_v28 = vpack.c.bf16 (!%p441_p9), %v2786_v26, %v2784_v25  ;;  %v2783_v29 = vld [vmem:[%s5191_s1 + $0x140] sm:$0xff] (!%p441_p9)  ;;  %v2785_v30 = vld [vmem:[%s5191_s1 + $0x150] sm:$0xff] (!%p441_p9)  ;;  %v2788_v31 = vld [vmem:[%s5191_s1 + $0x168] sm:$0xff] (!%p441_p9)  ;;  %vm2187_vm13 = vcmask (!%p441_p9), 651264   ;;  %s3719_s27 = smov (!%p441_p9), 32   ;;  %s3010_s26 = sshll.u32 (!%p441_p9), %s3822_s22, 4 }
  0x1a   : > { %v2790_v32 = vld [vmem:[%s5191_s1 + $0x178] sm:$0xff] (!%p441_p9)  ;;  %v3180_v33 = vpack.c.bf16 (!%p441_p9), %v2785_v30, %v2783_v29  ;;  %v2787_v35 = vld [vmem:[%s5191_s1 + $0x160] sm:$0xff] (!%p441_p9)  ;;  %v2789_v36 = vld [vmem:[%s5191_s1 + $0x170] sm:$0xff] (!%p441_p9) }
  0x1b   : > { %3169 = vmatpush1.bf16.msra.mxu0 %v3168_v14  ;;  %s488_s30 = scalar_select %p487_p10, %s3822_s22, 1  ;;  %v3182_v34 = vpack.c.bf16 %v2790_v32, %v2788_v31  ;;  %v497_v37 = vld [vmem:[%s5191_s1 + $0x8] sm:$0xff]  ;;  %v499_v38 = vld [vmem:[%s5191_s1 + $0x18] sm:$0xff]  ;;  %v3184_v39 = vpack.c.bf16 %v2789_v36, %v2787_v35  ;;  %v496_v41 = vld [vmem:[%s5191_s1] sm:$0xff] }
  0x1c   : > { %3171 = vmatprep.subr.bf16.mxu0 %v3170_v15  ;;  %v3186_v40 = vpack.c.bf16 %v499_v38, %v497_v37  ;;  %v498_v42 = vld [vmem:[%s5191_s1 + $0x10] sm:$0xff]  ;;  %v501_v43 = vld [vmem:[%s5191_s1 + $0x28] sm:$0xff]  ;;  %v503_v44 = vld [vmem:[%s5191_s1 + $0x38] sm:$0xff]  ;;  %s3720_s22 = smov [#allocation5]  }
  0x1d   : > { %s3013_s25 = sshll.u32 %s488_s30, 5  ;;  %v3188_v46 = vpack.c.bf16 %v498_v42, %v496_v41  ;;  %v3190_v47 = vpack.c.bf16 %v503_v44, %v501_v43  ;;  %v500_v48 = vld [vmem:[%s5191_s1 + $0x20] sm:$0xff]  ;;  %v502_v49 = vld [vmem:[%s5191_s1 + $0x30] sm:$0xff]  ;;  %v505_v50 = vld [vmem:[%s5191_s1 + $0x48] sm:$0xff]  ;;  %s485_s30 = sand.u32 1, %s3701_s19  }
  0x1e   : > { %s3934_s17 = scalar_lea.vmem %s5221_s0, %s3013_s25  ;;  %v507_v51 = vld [vmem:[%s5191_s1 + $0x58] sm:$0xff]  ;;  %v3192_v52 = vpack.c.bf16 %v502_v49, %v500_v48  ;;  %v504_v55 = vld [vmem:[%s5191_s1 + $0x40] sm:$0xff]  ;;  %v506_v56 = vld [vmem:[%s5191_s1 + $0x50] sm:$0xff]  ;;  %s3716_s0 = smov 80  }
  0x1f   : > { %3173 = vmatpush1.bf16.msra.mxu0 %v3172_v20  ;;  %v520_v45 = vld [vmem:[%s3934_s17 + $0x1] sm:$0xff]  ;;  %v521_v53 = vld [vmem:[%s3934_s17 + $0x9] sm:$0xff]  ;;  %v3194_v54 = vpack.c.bf16 %v507_v51, %v505_v50  ;;  %v511_v58 = vld [vmem:[%s5191_s1 + $0x78] sm:$0xff]  ;;  %v3196_v59 = vpack.c.bf16 %v506_v56, %v504_v55  ;;  %s3651_s18 = sshll.u32 %s3720_s22, 4  ;;  %s3652_s18 = int_to_ptr.vmem [resolvable:$false] %s3651_s18 }
  0x20   : > { %3175 = vmatprep.subr.bf16.mxu0 %v3174_v22  ;;  %v509_v57 = vld [vmem:[%s5191_s1 + $0x68] sm:$0xff]  ;;  %v522_v60 = vld [vmem:[%s3934_s17 + $0x11] sm:$0xff]  ;;  %v508_v62 = vld [vmem:[%s5191_s1 + $0x60] sm:$0xff] }
  0x21   : > { %v3198_v61 = vpack.c.bf16 %v511_v58, %v509_v57  ;;  %v510_v63 = vld [vmem:[%s5191_s1 + $0x70] sm:$0xff]  ;;  %v513_v0 = vld [vmem:[%s5191_s1 + $0x88] sm:$0xff]  ;;  %v515_v1 = vld [vmem:[%s5191_s1 + $0x98] sm:$0xff] }
  0x22   : > { %v3200_v2 = vpack.c.bf16 %v510_v63, %v508_v62  ;;  %v523_v3 = vld [vmem:[%s3934_s17 + $0x19] sm:$0xf]  ;;  %v3202_v4 = vpack.c.bf16 %v515_v1, %v513_v0  ;;  %v512_v5 = vld [vmem:[%s5191_s1 + $0x80] sm:$0xff]  ;;  %v514_v6 = vld [vmem:[%s5191_s1 + $0x90] sm:$0xff] }
  0x23   : > { %3177 = vmatpush1.bf16.msra.mxu0 %v3176_v27  ;;  %v517_v8 = vld [vmem:[%s5191_s1 + $0xa8] sm:$0xff]  ;;  %v519_v9 = vld [vmem:[%s5191_s1 + $0xb8] sm:$0xff]  ;;  %v3204_v10 = vpack.c.bf16 %v514_v6, %v512_v5  ;;  %v516_v12 = vld [vmem:[%s5191_s1 + $0xa0] sm:$0xff] }
  0x24   : > { %3179 = vmatprep.subr.bf16.mxu0 %v3178_v28  ;;  %v3206_v11 = vpack.c.bf16 %v519_v9, %v517_v8  ;;  %v518_v13 = vld [vmem:[%s5191_s1 + $0xb0] sm:$0xff]  ;;  %v2800_v14 = vld [vmem:[%s5191_s1 + $0x188] sm:$0xff]  ;;  %v2802_v15 = vld [vmem:[%s5191_s1 + $0x198] sm:$0xff] }
  0x25   : > { %v3208_v16 = vpack.c.bf16 %v518_v13, %v516_v12  ;;  %v3210_v17 = vpack.c.bf16 %v2802_v15, %v2800_v14  ;;  %v2799_v18 = vld [vmem:[%s5191_s1 + $0x180] sm:$0xff]  ;;  %v2801_v19 = vld [vmem:[%s5191_s1 + $0x190] sm:$0xff]  ;;  %v2804_v20 = vld [vmem:[%s5191_s1 + $0x1a8] sm:$0xff] }
  0x26   : > { %v2806_v22 = vld [vmem:[%s5191_s1 + $0x1b8] sm:$0xff]  ;;  %v1196_v23 = vld [vmem:[%s5193_s3] sm:$0xff]  ;;  %v1197_v24 = vld [vmem:[%s5193_s3 + $0x8] sm:$0xff]  ;;  %v3212_v28 = vpack.c.bf16 %v2801_v19, %v2799_v18 }
  0x27   : > { %3181 = vmatpush1.bf16.msra.mxu0 %v3180_v33  ;;  %v1198_v25 = vld [vmem:[%s5193_s3 + $0x10] sm:$0xff]  ;;  %v1199_v26 = vld [vmem:[%s5193_s3 + $0x18] sm:$0xff]  ;;  %v492_v27 = vld [vmem:[%s3934_s17] sm:$0xff]  ;;  %v3283_v29 = vpack.c.bf16 %v1197_v24, %v1196_v23  ;;  %v3214_v30 = vpack.c.bf16 %v2806_v22, %v2804_v20 }
  0x28   : > { %3183 = vmatprep.subr.bf16.mxu0 %v3182_v34  ;;  %v2803_v31 = vld [vmem:[%s5191_s1 + $0x1a0] sm:$0xff]  ;;  %v2805_v32 = vld [vmem:[%s5191_s1 + $0x1b0] sm:$0xff]  ;;  %v2808_v33 = vld [vmem:[%s5191_s1 + $0x1c8] sm:$0xff]  ;;  %v3286_v35 = vpack.c.bf16 %v1199_v26, %v1198_v25 }
  0x29   : > { %v2810_v34 = vld [vmem:[%s5191_s1 + $0x1d8] sm:$0xff]  ;;  %3284 = vmatpush1.bf16.msra.mxu1 %v3283_v29  ;;  %v1200_v36 = vld [vmem:[%s5193_s3 + $0x20] sm:$0xff]  ;;  %v1201_v37 = vld [vmem:[%s5193_s3 + $0x28] sm:$0xff]  ;;  %v3216_v38 = vpack.c.bf16 %v2805_v32, %v2803_v31 }
  0x2a   : > { %3285 = vmatprep.subr.bf16.mxu1 %v3712_v21  ;;  %v2807_v41 = vld [vmem:[%s5191_s1 + $0x1c0] sm:$0xff]  ;;  %v2809_v42 = vld [vmem:[%s5191_s1 + $0x1d0] sm:$0xff]  ;;  %v2812_v43 = vld [vmem:[%s5191_s1 + $0x1e8] sm:$0xff] }
  0x2b   : > { %3185 = vmatpush1.bf16.msra.mxu0 %v3184_v39  ;;  %v493_v39 = vld [vmem:[%s3934_s17 + $0x8] sm:$0xff]  ;;  %v2814_v44 = vld [vmem:[%s5191_s1 + $0x1f8] sm:$0xff]  ;;  %v3220_v48 = vpack.c.bf16 %v2809_v42, %v2807_v41  ;;  %v494_v49 = vld [vmem:[%s3934_s17 + $0x10] sm:$0xff] }
  0x2c   : > { %3187 = vmatprep.subr.bf16.mxu0 %v3186_v40  ;;  %v3218_v40 = vpack.c.bf16 %v2810_v34, %v2808_v33  ;;  %v3222_v50 = vpack.c.bf16 %v2814_v44, %v2812_v43  ;;  %v2811_v51 = vld [vmem:[%s5191_s1 + $0x1e0] sm:$0xff]  ;;  %v1205_v57 = vld [vmem:[%s5193_s3 + $0x48] sm:$0xff]  ;;  %v2817_v62 = vld [vmem:[%s5191_s1 + $0x210] sm:$0xff] }
  0x2d   : > { %3287 = vmatpush1.bf16.msra.mxu1 %v3286_v35  ;;  %v1204_v56 = vld [vmem:[%s5193_s3 + $0x40] sm:$0xff]  ;;  %v2820_v63 = vld [vmem:[%s5191_s1 + $0x228] sm:$0xff]  ;;  %v2822_v0 = vld [vmem:[%s5191_s1 + $0x238] sm:$0xff] }
  0x2e   : > { %2791 = vmatmul.mubr.msk.f32.vlgmr.msra.gmra.mrb[0].mxu0 %vm549_vm0, %v520_v45  ;;  %v3289_v45 = vpack.c.bf16 %v1201_v37, %v1200_v36  ;;  %3288 = vmatprep.subr.bf16.mxu1 %v3712_v21  ;;  %v3295_v1 = vpack.c.bf16 %v1205_v57, %v1204_v56  ;;  %v3230_v5 = vpack.c.bf16 %v2822_v0, %v2820_v63  ;;  %v2819_v6 = vld [vmem:[%s5191_s1 + $0x220] sm:$0xff]  ;;  %v2821_v8 = vld [vmem:[%s5191_s1 + $0x230] sm:$0xff]  ;;  %v2828_v9 = vld [vmem:[%s5191_s1 + $0x248] sm:$0xff] }
  0x2f   : > { %3189 = vmatpush1.bf16.msra.mxu0 %v3188_v46  ;;  %632 = vmatprep.mubr.f32.mxu0 %v3711_v7  ;;  %v1202_v46 = vld [vmem:[%s5193_s3 + $0x30] sm:$0xff]  ;;  %v1208_v12 = vld [vmem:[%s5193_s3 + $0x60] sm:$0xff]  ;;  %v1209_v13 = vld [vmem:[%s5193_s3 + $0x68] sm:$0xff]  ;;  %v3232_v14 = vpack.c.bf16 %v2821_v8, %v2819_v6 }
  0x30   : > { %3191 = vmatprep.subr.bf16.mxu0 %v3190_v47  ;;  %v1203_v47 = vld [vmem:[%s5193_s3 + $0x38] sm:$0xff]  ;;  %v2832_v18 = vld [vmem:[%s5191_s1 + $0x268] sm:$0xff]  ;;  %v3301_v20 = vpack.c.bf16 %v1209_v13, %v1208_v12  ;;  %v1210_v22 = vld [vmem:[%s5193_s3 + $0x70] sm:$0xff] }
  0x31   : > { %3290 = vmatpush1.bf16.msra.mxu1 %v3289_v45  ;;  %v3292_v55 = vpack.c.bf16 %v1203_v47, %v1202_v46  ;;  %v2834_v19 = vld [vmem:[%s5191_s1 + $0x278] sm:$0xff]  ;;  %v752_v24 = vld [vmem:[%s3934_s17 + $0x2] sm:$0xff]  ;;  %v753_v35 = vld [vmem:[%s3934_s17 + $0xa] sm:$0xff] }
  0x32   : > { %2792 = vmatmul.mubr.msk.f32.gmra.mrb[2].mxu0 %vm549_vm0, %v521_v53  ;;  %v2816_v53 = vld [vmem:[%s5191_s1 + $0x208] sm:$0xff]  ;;  %3291 = vmatprep.subr.bf16.mxu1 %v3712_v21  ;;  %v1211_v23 = vld [vmem:[%s5193_s3 + $0x78] sm:$0xff]  ;;  %v3238_v26 = vpack.c.bf16 %v2834_v19, %v2832_v18  ;;  %v1212_v32 = vld [vmem:[%s5193_s3 + $0x80] sm:$0xff] }
  0x33   : > { %3193 = vmatpush1.bf16.msra.mxu0 %v3192_v52  ;;  %638 = vmatprep.mubr.f32.mxu0 %v3711_v7  ;;  %v2813_v52 = vld [vmem:[%s5191_s1 + $0x1f0] sm:$0xff]  ;;  %v2836_v29 = vld [vmem:[%s5191_s1 + $0x288] sm:$0xff]  ;;  %v3304_v31 = vpack.c.bf16 %v1211_v23, %v1210_v22  ;;  %v2835_v37 = vld [vmem:[%s5191_s1 + $0x280] sm:$0xff] }
  0x34   : > { %3195 = vmatprep.subr.bf16.mxu0 %v3194_v54  ;;  %v2818_v54 = vld [vmem:[%s5191_s1 + $0x218] sm:$0xff]  ;;  %v3224_v58 = vpack.c.bf16 %v2813_v52, %v2811_v51  ;;  %v1213_v33 = vld [vmem:[%s5193_s3 + $0x88] sm:$0xff]  ;;  %v2839_v45 = vld [vmem:[%s5191_s1 + $0x2a0] sm:$0xff] }
  0x35   : > { %3293 = vmatpush1.bf16.msra.mxu1 %v3292_v55  ;;  %v3307_v41 = vpack.c.bf16 %v1213_v33, %v1212_v32  ;;  %v754_v43 = vld [vmem:[%s3934_s17 + $0x12] sm:$0xff]  ;;  %v2844_v47 = vld [vmem:[%s5191_s1 + $0x2c8] sm:$0xff]  ;;  %v2843_v52 = vld [vmem:[%s5191_s1 + $0x2c0] sm:$0xff] }
  0x36   : > { %2793 = vmatmul.mubr.msk.f32.gmra.mrb[4].mxu0 %vm549_vm0, %v522_v60  ;;  %v3226_v60 = vpack.c.bf16 %v2818_v54, %v2816_v53  ;;  %3294 = vmatprep.subr.bf16.mxu1 %v3712_v21  ;;  %v2841_v46 = vld [vmem:[%s5191_s1 + $0x2b0] sm:$0xff]  ;;  %v2848_v54 = vld [vmem:[%s5191_s1 + $0x2e8] sm:$0xff]  ;;  %v2850_v55 = vld [vmem:[%s5191_s1 + $0x2f8] sm:$0xff] }
  0x37   : > { %3197 = vmatpush1.bf16.msra.mxu0 %v3196_v59  ;;  %644 = vmatprep.mubr.f32.mxu0 %v3711_v7  ;;  %v495_v59 = vld [vmem:[%s3934_s17 + $0x18] sm:$0xf]  ;;  %v2845_v53 = vld [vmem:[%s5191_s1 + $0x2d0] sm:$0xff]  ;;  %v3254_v57 = vpack.c.bf16 %v2850_v55, %v2848_v54  ;;  %v2855_v0 = vld [vmem:[%s5191_s1 + $0x300] sm:$0xff] }
  0x38   : > { %3199 = vmatprep.subr.bf16.mxu0 %v3198_v61  ;;  %v2815_v61 = vld [vmem:[%s5191_s1 + $0x200] sm:$0xff]  ;;  %v3252_v56 = vpack.c.bf16 %v2845_v53, %v2843_v52  ;;  %v891_v13 = vld [vmem:[%s3934_s17 + $0xb] sm:$0xff]  ;;  %v2870_v18 = vld [vmem:[%s5191_s1 + $0x378] sm:$0xff] }
  0x39   : > { %3296 = vmatpush1.bf16.msra.mxu1 %v3295_v1  ;;  %v2857_v1 = vld [vmem:[%s5191_s1 + $0x310] sm:$0xff]  ;;  %v2859_v8 = vld [vmem:[%s5191_s1 + $0x320] sm:$0xff]  ;;  %v2876_v32 = vld [vmem:[%s5191_s1 + $0x3a8] sm:$0xff] }
  0x3a   : > { %2794 = vmatmul.mubr.msk.f32.gmra.mrb[6].mxu0 %vm549_vm0, %v523_v3  ;;  %v1207_v3 = vld [vmem:[%s5193_s3 + $0x58] sm:$0xff]  ;;  %3297 = vmatprep.subr.bf16.mxu1 %v3712_v21  ;;  %v2867_v23 = vld [vmem:[%s5191_s1 + $0x360] sm:$0xff]  ;;  %vm3317_vm5 = vmpackc.low %vm1322_vm3, %vm3713_vm4 }
  0x3b   : > { %3201 = vmatpush1.bf16.msra.mxu0 %v3200_v2  ;;  %727 = vmatprep.mubr.f32.mxu0 %v3711_v7  ;;  %v1206_v2 = vld [vmem:[%s5193_s3 + $0x50] sm:$0xff]  ;;  %v2878_v33 = vld [vmem:[%s5191_s1 + $0x3b8] sm:$0xff]  ;;  %vm3454_vm11 = vmpackc.low %vm2113_vm10, %vm3713_vm4 }
  0x3c   : > { %3203 = vmatprep.subr.bf16.mxu0 %v3202_v4  ;;  %v3228_v4 = vpack.c.bf16 %v2817_v62, %v2815_v61  ;;  %v2858_v61 = vld [vmem:[%s5191_s1 + $0x318] sm:$0xff] }
  0x3f   : > { %3205 = vmatpush1.bf16.msra.mxu0 %v3204_v10  ;;  %v2830_v10 = vld [vmem:[%s5191_s1 + $0x258] sm:$0xff] }
  0x40   : > { %3207 = vmatprep.subr.bf16.mxu0 %v3206_v11  ;;  %v3298_v11 = vpack.c.bf16 %v1207_v3, %v1206_v2  ;;  %v3234_v15 = vpack.c.bf16 %v2830_v10, %v2828_v9  ;;  %v2860_v2 = vld [vmem:[%s5191_s1 + $0x328] sm:$0xff]  ;;  %v2862_v3 = vld [vmem:[%s5191_s1 + $0x338] sm:$0xff]  ;;  %v2861_v9 = vld [vmem:[%s5191_s1 + $0x330] sm:$0xff] }
  0x41   : > { %v3262_v6 = vpack.c.bf16 %v2862_v3, %v2860_v2  ;;  %v2864_v10 = vld [vmem:[%s5191_s1 + $0x348] sm:$0xff]  ;;  %v3264_v12 = vpack.c.bf16 %v2861_v9, %v2859_v8 }
  0x42   : > { %3299 = vmatpush1.bf16.msra.mxu1 %v3298_v11  ;;  %v2866_v11 = vld [vmem:[%s5191_s1 + $0x358] sm:$0xff] }
  0x43   : > { %3209 = vmatpush1.bf16.msra.mxu0 %v3208_v16  ;;  %v2827_v16 = vld [vmem:[%s5191_s1 + $0x240] sm:$0xff]  ;;  %3300 = vmatprep.subr.bf16.mxu1 %v3712_v21 }
  0x44   : > { %3211 = vmatprep.subr.bf16.mxu0 %v3210_v17  ;;  %v2829_v17 = vld [vmem:[%s5191_s1 + $0x250] sm:$0xff] }
  0x45   : > { %v3236_v25 = vpack.c.bf16 %v2829_v17, %v2827_v16  ;;  %v2865_v16 = vld [vmem:[%s5191_s1 + $0x350] sm:$0xff]  ;;  %v2868_v17 = vld [vmem:[%s5191_s1 + $0x368] sm:$0xff] }
  0x46   : > { %2795 = vmatmul.mubr.msk.f32.vlgmr.msra.gmra.mrb[0].mxu0 %vm549_vm0, %v492_v27  ;;  %v2831_v27 = vld [vmem:[%s5191_s1 + $0x260] sm:$0xff]  ;;  %3302 = vmatpush1.bf16.msra.mxu1 %v3301_v20  ;;  %v892_v20 = vld [vmem:[%s3934_s17 + $0x13] sm:$0xff]  ;;  %v3270_v22 = vpack.c.bf16 %v2870_v18, %v2868_v17 }
  0x47   : > { %3213 = vmatpush1.bf16.msra.mxu0 %v3212_v28  ;;  %733 = vmatprep.mubr.f32.mxu0 %v3711_v7  ;;  %v2833_v28 = vld [vmem:[%s5191_s1 + $0x270] sm:$0xff] }
  0x48   : > { %3215 = vmatprep.subr.bf16.mxu0 %v3214_v30  ;;  %v2838_v30 = vld [vmem:[%s5191_s1 + $0x298] sm:$0xff]  ;;  %3303 = vmatprep.subr.bf16.mxu1 %v3712_v21  ;;  %v3240_v34 = vpack.c.bf16 %v2833_v28, %v2831_v27 }
  0x49   : > { %v3242_v36 = vpack.c.bf16 %v2838_v30, %v2836_v29  ;;  %v893_v28 = vld [vmem:[%s3934_s17 + $0x1b] sm:$0xf]  ;;  %v2871_v30 = vld [vmem:[%s5191_s1 + $0x380] sm:$0xff] }
  0x4a   : > { %2796 = vmatmul.mubr.msk.f32.gmra.mrb[2].mxu0 %vm549_vm0, %v493_v39  ;;  %v2840_v39 = vld [vmem:[%s5191_s1 + $0x2a8] sm:$0xff]  ;;  %3305 = vmatpush1.bf16.msra.mxu1 %v3304_v31  ;;  %v2873_v31 = vld [vmem:[%s5191_s1 + $0x390] sm:$0xff] }
  0x4b   : > { %3217 = vmatpush1.bf16.msra.mxu0 %v3216_v38  ;;  %739 = vmatprep.mubr.f32.mxu0 %v3711_v7  ;;  %v2837_v38 = vld [vmem:[%s5191_s1 + $0x290] sm:$0xff] }
  0x4c   : > { %3219 = vmatprep.subr.bf16.mxu0 %v3218_v40  ;;  %v2842_v40 = vld [vmem:[%s5191_s1 + $0x2b8] sm:$0xff]  ;;  %3306 = vmatprep.subr.bf16.mxu1 %v3712_v21  ;;  %v3244_v42 = vpack.c.bf16 %v2837_v38, %v2835_v37  ;;  %v2877_v37 = vld [vmem:[%s5191_s1 + $0x3b0] sm:$0xff] }
  0x4d   : > { %v3246_v44 = vpack.c.bf16 %v2842_v40, %v2840_v39  ;;  %v1028_v39 = vld [vmem:[%s3934_s17 + $0x4] sm:$0xff]  ;;  %v1029_v40 = vld [vmem:[%s3934_s17 + $0xc] sm:$0xff] }
  0x4e   : > { %2797 = vmatmul.mubr.msk.f32.gmra.mrb[4].mxu0 %vm549_vm0, %v494_v49  ;;  %3308 = vmatpush1.bf16.msra.mxu1 %v3307_v41  ;;  %v3248_v49 = vpack.c.bf16 %v2841_v46, %v2839_v45  ;;  %v1030_v41 = vld [vmem:[%s3934_s17 + $0x14] sm:$0xff]  ;;  %v1216_v46 = vld [vmem:[%s5193_s3 + $0xa0] sm:$0xff] }
  0x4f   : > { %3221 = vmatpush1.bf16.msra.mxu0 %v3220_v48  ;;  %745 = vmatprep.mubr.f32.mxu0 %v3711_v7  ;;  %v2846_v48 = vld [vmem:[%s5191_s1 + $0x2d8] sm:$0xff] }
  0x50   : > { %3223 = vmatprep.subr.bf16.mxu0 %v3222_v50  ;;  %3309 = vmatprep.subr.bf16.mxu1 %v3712_v21  ;;  %v755_v50 = vld [vmem:[%s3934_s17 + $0x1a] sm:$0xf]  ;;  %v3250_v51 = vpack.c.bf16 %v2846_v48, %v2844_v47  ;;  %v1168_v47 = vlaneseq }
  0x52   : > { %2798 = vmatmul.mubr.msk.f32.gmra.mrb[6].mxu0 %vm549_vm0, %v495_v59  ;;  %v2849_v59 = vld [vmem:[%s5191_s1 + $0x2f0] sm:$0xff]  ;;  %v4352_v48 = vshrl.u32 %v1168_v47, 7  ;;  %vm2192_vm14 = vcmp.lt.s32.totalorder %v1168_v47, 80  ;;  %vm4985_vm15 = vcmp.ge.s32.totalorder %v1168_v47, 80  ;;  %vm5000_vm4 = vcmp.lt.s32.totalorder %v1168_v47, 112 }
  0x53   : > { %3225 = vmatpush1.bf16.msra.mxu0 %v3224_v58  ;;  %857 = vmatprep.mubr.f32.mxu0 %v3711_v7  ;;  %v2847_v58 = vld [vmem:[%s5191_s1 + $0x2e0] sm:$0xff] }
  0x54   : > { %3227 = vmatprep.subr.bf16.mxu0 %v3226_v60  ;;  %v2856_v60 = vld [vmem:[%s5191_s1 + $0x308] sm:$0xff]  ;;  %v3256_v62 = vpack.c.bf16 %v2849_v59, %v2847_v58 }
  0x55   : > { %v3258_v63 = vpack.c.bf16 %v2858_v61, %v2856_v60 }
  0x57   : > { %3229 = vmatpush1.bf16.msra.mxu0 %v3228_v4  ;;  %v890_v4 = vld [vmem:[%s3934_s17 + $0x3] sm:$0xff] }
  0x58   : > { %3231 = vmatprep.subr.bf16.mxu0 %v3230_v5  ;;  %v3260_v5 = vpack.c.bf16 %v2857_v1, %v2855_v0 }
  0x5b   : > { %3233 = vmatpush1.bf16.msra.mxu0 %v3232_v14  ;;  %v3266_v14 = vpack.c.bf16 %v2866_v11, %v2864_v10 }
  0x5c   : > { %3235 = vmatprep.subr.bf16.mxu0 %v3234_v15  ;;  %v2863_v15 = vld [vmem:[%s5191_s1 + $0x340] sm:$0xff] }
  0x5d   : > { %v3268_v19 = vpack.c.bf16 %v2865_v16, %v2863_v15  ;;  %v1194_v15 = vld [vmem:[%s5194_s4] sm:$0xff] }
  0x5e   : > { %2823 = vmatmul.mubr.msk.f32.vlgmr.msra.gmra.mrb[0].mxu0 %vm549_vm0, %v752_v24  ;;  %v2869_v24 = vld [vmem:[%s5191_s1 + $0x370] sm:$0xff] }
  0x5f   : > { %3237 = vmatpush1.bf16.msra.mxu0 %v3236_v25  ;;  %863 = vmatprep.mubr.f32.mxu0 %v3711_v7  ;;  %v2872_v25 = vld [vmem:[%s5191_s1 + $0x388] sm:$0xff]  ;;  %v3272_v27 = vpack.c.bf16 %v2869_v24, %v2867_v23  ;;  %v2891_v24 = vld [vmem:[%s5195_s5 + $0xb8] sm:$0xff] }
  0x60   : > { %3239 = vmatprep.subr.bf16.mxu0 %v3238_v26  ;;  %v2874_v26 = vld [vmem:[%s5191_s1 + $0x398] sm:$0xff] }
  0x61   : > { %v3274_v29 = vpack.c.bf16 %v2874_v26, %v2872_v25  ;;  %v2893_v25 = vld [vmem:[%s5195_s5 + $0xc8] sm:$0xff] }
  0x62   : > { %2824 = vmatmul.mubr.msk.f32.gmra.mrb[2].mxu0 %vm549_vm0, %v753_v35  ;;  %v3278_v35 = vpack.c.bf16 %v2878_v33, %v2876_v32  ;;  %v2895_v32 = vld [vmem:[%s5195_s5 + $0xd8] sm:$0xff]  ;;  %v2897_v33 = vld [vmem:[%s5195_s5 + $0xe8] sm:$0xff] }
  0x63   : > { %3241 = vmatpush1.bf16.msra.mxu0 %v3240_v34  ;;  %869 = vmatprep.mubr.f32.mxu0 %v3711_v7  ;;  %v3276_v34 = vpack.c.bf16 %v2873_v31, %v2871_v30  ;;  %v2890_v30 = vld [vmem:[%s5195_s5 + $0xb0] sm:$0xff]  ;;  %v2892_v31 = vld [vmem:[%s5195_s5 + $0xc0] sm:$0xff] }
  0x64   : > { %3243 = vmatprep.subr.bf16.mxu0 %v3242_v36  ;;  %v2875_v36 = vld [vmem:[%s5191_s1 + $0x3a0] sm:$0xff] }
  0x65   : > { %v3280_v38 = vpack.c.bf16 %v2877_v37, %v2875_v36  ;;  %v3326_v36 = vpack.c.bf16 %v2897_v33, %v2895_v32  ;;  %v2894_v37 = vld [vmem:[%s5195_s5 + $0xd0] sm:$0xff]  ;;  %v1412_v33 = vld [vmem:[%s5195_s5 + $0x28] sm:$0xff] }
  0x66   : > { %2825 = vmatmul.mubr.msk.f32.gmra.mrb[4].mxu0 %vm549_vm0, %v754_v43  ;;  %v1214_v43 = vld [vmem:[%s5193_s3 + $0x90] sm:$0xff] }
  0x67   : > { %3245 = vmatpush1.bf16.msra.mxu0 %v3244_v42  ;;  %875 = vmatprep.mubr.f32.mxu0 %v3711_v7  ;;  %v1031_v42 = vld [vmem:[%s3934_s17 + $0x1c] sm:$0xf]  ;;  %v1409_v32 = vld [vmem:[%s5195_s5 + $0x10] sm:$0xff]  ;;  %s3653_s17 = scalar_lea.vmem %s3652_s18, 32 }
  0x68   : > { %3247 = vmatprep.subr.bf16.mxu0 %v3246_v44  ;;  %v1215_v44 = vld [vmem:[%s5193_s3 + $0x98] sm:$0xff] }
  0x69   : > { %v3310_v45 = vpack.c.bf16 %v1215_v44, %v1214_v43  ;;  %v2898_v43 = vld [vmem:[%s5195_s5 + $0xf0] sm:$0xff]  ;;  %v2900_v44 = vld [vmem:[%s5195_s5 + $0x100] sm:$0xff] }
  0x6a   : > { %2826 = vmatmul.mubr.msk.f32.gmra.mrb[6].mxu0 %vm549_vm0, %v755_v50  ;;  %v1166_v50 = vld [vmem:[%s5192_s2] sm:$0x3] }
  0x6b   : > { %3249 = vmatpush1.bf16.msra.mxu0 %v3248_v49  ;;  %995 = vmatprep.mubr.f32.mxu0 %v3711_v7  ;;  %v4355_v49 = vsub.s32 0, %v4352_v48 }
  0x6c   : > { %3251 = vmatprep.subr.bf16.mxu0 %v3250_v51  ;;  %3311 = vmatpush1.bf16.msra.mxu1 %v3310_v45  ;;  %v4361_v51 = vsub.s32 1, %v4352_v48  ;;  %v2903_v45 = vld [vmem:[%s5195_s5 + $0x118] sm:$0xff] }
  0x6d   : > { %1270 = vmatprep.subr.mxu1 %v3711_v7  ;;  %v1171_v52 = vrot.slane %v1166_v50, %v4355_v49 }
  0x6e   : > { %v1175_v53 = vrot.slane %v1166_v50, %v4361_v51  ;;  %v3332_v50 = vpack.c.bf16 %v2900_v44, %v2898_v43  ;;  %v1415_v44 = vld [vmem:[%s5195_s5 + $0x40] sm:$0xff] }
  0x6f   : > { %3253 = vmatpush1.bf16.msra.mxu0 %v3252_v56 }
  0x70   : > { %3255 = vmatprep.subr.bf16.mxu0 %v3254_v57  ;;  %1271 = vmatpush1.msra.mxu1 %v1216_v46  ;;  %v2905_v46 = vld [vmem:[%s5195_s5 + $0x128] sm:$0xff] }
  0x73   : > { %3257 = vmatpush1.bf16.msra.mxu0 %v3256_v62 }
  0x74   : > { %3259 = vmatprep.subr.bf16.mxu0 %v3258_v63 }
  0x76   : > { %2851 = vmatmul.mubr.msk.f32.vlgmr.msra.gmra.mrb[0].mxu0 %vm549_vm0, %v890_v4 }
  0x77   : > { %3261 = vmatpush1.bf16.msra.mxu0 %v3260_v5  ;;  %1001 = vmatprep.mubr.f32.mxu0 %v3711_v7 }
  0x78   : > { %3263 = vmatprep.subr.bf16.mxu0 %v3262_v6 }
  0x7a   : > { %2852 = vmatmul.mubr.msk.f32.gmra.mrb[2].mxu0 %vm549_vm0, %v891_v13 }
  0x7b   : > { %3265 = vmatpush1.bf16.msra.mxu0 %v3264_v12  ;;  %1007 = vmatprep.mubr.f32.mxu0 %v3711_v7 }
  0x7c   : > { %3267 = vmatprep.subr.bf16.mxu0 %v3266_v14 }
  0x7e   : > { %2853 = vmatmul.mubr.msk.f32.gmra.mrb[4].mxu0 %vm549_vm0, %v892_v20 }
  0x7f   : > { %3269 = vmatpush1.bf16.msra.mxu0 %v3268_v19  ;;  %1013 = vmatprep.mubr.f32.mxu0 %v3711_v7 }
  0x80   : > { %3271 = vmatprep.subr.bf16.mxu0 %v3270_v22 }
  0x82   : > { %2854 = vmatmul.mubr.msk.f32.gmra.mrb[6].mxu0 %vm549_vm0, %v893_v28 }
  0x83   : > { %3273 = vmatpush1.bf16.msra.mxu0 %v3272_v27  ;;  %1133 = vmatprep.mubr.f32.mxu0 %v3711_v7 }
  0x84   : > { %3275 = vmatprep.subr.bf16.mxu0 %v3274_v29  ;;  %v3322_v29 = vpack.c.bf16 %v2893_v25, %v2891_v24  ;;  %v2020_v24 = vld [vmem:[%s5197_s7 + $0x68] sm:$0xff] }
  0x87   : > { %3277 = vmatpush1.bf16.msra.mxu0 %v3276_v34  ;;  %v1195_v34 = vld [vmem:[%s5194_s4 + $0x8] sm:$0x3f] }
  0x88   : > { %3279 = vmatprep.subr.bf16.mxu0 %v3278_v35  ;;  %v3324_v35 = vpack.c.bf16 %v2892_v31, %v2890_v30  ;;  %v1407_v31 = vld [vmem:[%s5195_s5] sm:$0xff] }
  0x8b   : > { %3281 = vmatpush1.bf16.msra.mxu0 %v3280_v38  ;;  %v2896_v38 = vld [vmem:[%s5195_s5 + $0xe0] sm:$0xff] }
  0x8c   : > { %3422 = vmatprep.subr.bf16.mxu0 %v3712_v21 }
  0x8e   : > { %2879 = vmatmul.mubr.msk.f32.vlgmr.msra.gmra.mrb[0].mxu0 %vm549_vm0, %v1028_v39  ;;  %v2899_v39 = vld [vmem:[%s5195_s5 + $0xf8] sm:$0xff] }
  0x8f   : > { %1139 = vmatprep.mubr.f32.mxu0 %v3711_v7 }
  0x92   : > { %2880 = vmatmul.mubr.msk.f32.gmra.mrb[2].mxu0 %vm549_vm0, %v1029_v40  ;;  %v2901_v40 = vld [vmem:[%s5195_s5 + $0x108] sm:$0xff] }
  0x93   : > { %1145 = vmatprep.mubr.f32.mxu0 %v3711_v7 }
  0x96   : > { %2881 = vmatmul.mubr.msk.f32.gmra.mrb[4].mxu0 %vm549_vm0, %v1030_v41  ;;  %v3328_v41 = vpack.c.bf16 %v2896_v38, %v2894_v37  ;;  %v1411_v37 = vld [vmem:[%s5195_s5 + $0x20] sm:$0xff]  ;;  %v1413_v38 = vld [vmem:[%s5195_s5 + $0x30] sm:$0xff] }
  0x97   : > { %1151 = vmatprep.mubr.f32.mxu0 %v3711_v7 }
  0x9a   : > { %2882 = vmatmul.mubr.msk.f32.gmra.mrb[6].mxu0 %vm549_vm0, %v1031_v42  ;;  %v3330_v42 = vpack.c.bf16 %v2901_v40, %v2899_v39  ;;  %v1416_v40 = vld [vmem:[%s5195_s5 + $0x48] sm:$0xff]  ;;  %vm4990_vm0 = vcmp.lt.s32.totalorder %v1168_v47, 160 }
 0x161   : > { %v1135_v54 = vpop.f32.mrb[0].mxu0 }
 0x162   : > { %v1178_v55 = vadd.f32 %v1171_v52, %v1135_v54  ;;  %v1137_v56 = vpop.f32.mrb[1].mxu0  ;;  %v2904_v54 = vld [vmem:[%s5195_s5 + $0x120] sm:$0xff] }
 0x163   : > { %v1179_v57 = vadd.f32 %v1175_v53, %v1137_v56  ;;  %v2907_v56 = vld [vmem:[%s5195_s5 + $0x138] sm:$0xff] }
 0x164   : > { %v1186_v60 = vmax.f32 %v1178_v55, 0.0 }
 0x165   : > { %v1187_v58 = vmax.f32 %v1179_v57, 0.0  ;;  %v1141_v59 = vpop.f32.mrb[2].mxu0  ;;  %v2909_v57 = vld [vmem:[%s5195_s5 + $0x148] sm:$0xff] }
 0x166   : > { %v1180_v61 = vadd.f32 %v1171_v52, %v1141_v59  ;;  %v1143_v62 = vpop.f32.mrb[3].mxu0  ;;  %v2906_v59 = vld [vmem:[%s5195_s5 + $0x130] sm:$0xff] }
 0x167   : > { %v1181_v63 = vadd.f32 %v1175_v53, %v1143_v62  ;;  %2883 = vmatprep.mubr.msk.f32.mxu1 %vm1217_vm1, %v1187_v58  ;;  %v3338_v58 = vpack.c.bf16 %v2909_v57, %v2907_v56  ;;  %v2911_v62 = vld [vmem:[%s5195_s5 + $0x158] sm:$0xf]  ;;  %v1421_v56 = vld [vmem:[%s5195_s5 + $0x70] sm:$0xff]  ;;  %v1424_v57 = vld [vmem:[%s5195_s5 + $0x88] sm:$0xff] }
 0x168   : > { %1295 = vmatmul.mubr.f32.vlgmr.msra.gmra.mrb[0].mxu1 %v1186_v60  ;;  %v1188_v2 = vmax.f32 %v1180_v61, 0.0  ;;  %v2908_v60 = vld [vmem:[%s5195_s5 + $0x140] sm:$0xff] }
 0x169   : > { %v1189_v0 = vmax.f32 %v1181_v63, 0.0  ;;  %v1147_v1 = vpop.f32.mrb[4].mxu0  ;;  %v3340_v61 = vpack.c.bf16 %v2908_v60, %v2906_v59  ;;  %v1408_v63 = vld [vmem:[%s5195_s5 + $0x8] sm:$0xff] }
 0x16a   : > { %v1182_v3 = vadd.f32 %v1171_v52, %v1147_v1  ;;  %v1149_v4 = vpop.f32.mrb[5].mxu0  ;;  %v2910_v1 = vld [vmem:[%s5195_s5 + $0x150] sm:$0xf] }
 0x16b   : > { %v1183_v5 = vadd.f32 %v1175_v53, %v1149_v4  ;;  %2884 = vmatprep.mubr.msk.f32.mxu1 %vm1217_vm1, %v1189_v0  ;;  %v1410_v0 = vld [vmem:[%s5195_s5 + $0x18] sm:$0xff]  ;;  %v2008_v4 = vld [vmem:[%s5197_s7 + $0x8] sm:$0xff] }
 0x16c   : > { %1300 = vmatmul.mubr.f32.gmra.mrb[2].mxu1 %v1188_v2  ;;  %v1190_v9 = vmax.f32 %v1182_v3, 0.0  ;;  %v3342_v2 = vpack.c.bf16 %v1410_v0, %v1408_v63  ;;  %v2007_v3 = vld [vmem:[%s5197_s7] sm:$0xff]  ;;  %v1428_v0 = vld [vmem:[%s5195_s5 + $0xa8] sm:$0xf] }
 0x16d   : > { %v1191_v6 = vmax.f32 %v1183_v5, 0.0  ;;  %v1153_v8 = vpop.f32.mrb[6].mxu0  ;;  %v2009_v5 = vld [vmem:[%s5197_s7 + $0x10] sm:$0xff] }
 0x16e   : > { %v1184_v10 = vadd.f32 %v1171_v52, %v1153_v8  ;;  %v1155_v11 = vpop.f32.mrb[7].mxu0  ;;  %v3334_v52 = vpack.c.bf16 %v2905_v46, %v2903_v45  ;;  %v2010_v8 = vld [vmem:[%s5197_s7 + $0x18] sm:$0xff]  ;;  %v1417_v45 = vld [vmem:[%s5195_s5 + $0x50] sm:$0xff] }
 0x16f   : > { %v1185_v12 = vadd.f32 %v1175_v53, %v1155_v11  ;;  %2885 = vmatprep.mubr.msk.f32.mxu1 %vm1217_vm1, %v1191_v6  ;;  %v2902_v53 = vld [vmem:[%s5195_s5 + $0x110] sm:$0xff]  ;;  %v3423_v6 = vpack.c.bf16 %v2008_v4, %v2007_v3  ;;  %v2012_v11 = vld [vmem:[%s5197_s7 + $0x28] sm:$0xff]  ;;  %v2920_v3 = vld [vmem:[%s5195_s5 + $0x160] sm:$0xff] }
 0x170   : > { %1305 = vmatmul.mubr.f32.gmra.mrb[4].mxu1 %v1190_v9  ;;  %v1192_v14 = vmax.f32 %v1184_v10, 0.0  ;;  %v3336_v55 = vpack.c.bf16 %v2904_v54, %v2902_v53  ;;  %v3426_v9 = vpack.c.bf16 %v2010_v8, %v2009_v5  ;;  %v2011_v10 = vld [vmem:[%s5197_s7 + $0x20] sm:$0xff]  ;;  %v3352_v53 = vpack.c.bf16 %v1417_v45, %v1415_v44  ;;  %v2922_v4 = vld [vmem:[%s5195_s5 + $0x170] sm:$0xff]  ;;  %v2925_v5 = vld [vmem:[%s5195_s5 + $0x188] sm:$0xff] }
 0x171   : > { %v1193_v13 = vmax.f32 %v1185_v12, 0.0  ;;  %3424 = vmatpush1.bf16.msra.mxu0 %v3423_v6  ;;  %v3429_v12 = vpack.c.bf16 %v2012_v11, %v2011_v10  ;;  %v2927_v6 = vld [vmem:[%s5195_s5 + $0x198] sm:$0xff]  ;;  %v1427_v8 = vld [vmem:[%s5195_s5 + $0xa0] sm:$0xf]  ;;  %v3364_v10 = vpack.c.bf16 %v2922_v4, %v2920_v3  ;;  %v2965_v4 = vld [vmem:[%s5195_s5 + $0x2a8] sm:$0xff] }
 0x172   : > { %3425 = vmatprep.subr.bf16.mxu0 %v3712_v21  ;;  %v3366_v11 = vpack.c.bf16 %v2927_v6, %v2925_v5  ;;  %v2963_v3 = vld [vmem:[%s5195_s5 + $0x298] sm:$0xff] }
 0x173   : > { %2886 = vmatprep.mubr.msk.f32.mxu1 %vm1217_vm1, %v1193_v13  ;;  %v2013_v13 = vld [vmem:[%s5197_s7 + $0x30] sm:$0xff]  ;;  %v3398_v6 = vpack.c.bf16 %v2965_v4, %v2963_v3  ;;  %vm2214_vm1 = vcmask 654336  }
 0x174   : > { %1310 = vmatmul.mubr.f32.gmra.mrb[6].mxu1 %v1192_v14  ;;  %v2014_v14 = vld [vmem:[%s5197_s7 + $0x38] sm:$0xff] }
 0x175   : > { %3094 = vmatprep.mubr.msk.f32.mxu1 %vm1315_vm2, %v1194_v15  ;;  %3427 = vmatpush1.bf16.msra.mxu0 %v3426_v9  ;;  %v3432_v15 = vpack.c.bf16 %v2014_v14, %v2013_v13  ;;  %v2926_v13 = vld [vmem:[%s5195_s5 + $0x190] sm:$0xff] }
 0x176   : > { %3428 = vmatprep.subr.bf16.mxu0 %v3712_v21 }
 0x179   : > { %3430 = vmatpush1.bf16.msra.mxu0 %v3429_v12  ;;  %v2924_v12 = vld [vmem:[%s5195_s5 + $0x180] sm:$0xff] }
 0x17a   : > { %3431 = vmatprep.subr.bf16.mxu0 %v3712_v21 }
 0x17d   : > { %3433 = vmatpush1.bf16.msra.mxu0 %v3432_v15  ;;  %v2929_v15 = vld [vmem:[%s5195_s5 + $0x1a8] sm:$0xff] }
 0x17e   : > { %3434 = vmatprep.subr.bf16.mxu0 %v3712_v21 }
 0x23b   : > { %v1296_v16 = vpop.f32.mrb[0].mxu1 }
 0x23c   : > { %v1298_v17 = vpop.f32.mrb[1].mxu1 }
 0x23d   : > { %v2016_v17 = vld [vmem:[%s5197_s7 + $0x48] sm:$0xff] }
 0x23f   : > { %v1301_v18 = vpop.f32.mrb[2].mxu1 }
 0x240   : > { %v3312_v19 = vpack.c.bf16 %v1301_v18, %v1296_v16  ;;  %v1303_v20 = vpop.f32.mrb[3].mxu1  ;;  %v2015_v16 = vld [vmem:[%s5197_s7 + $0x40] sm:$0xff] }
 0x241   : > { %v3435_v18 = vpack.c.bf16 %v2016_v17, %v2015_v16  ;;  %v2018_v20 = vld [vmem:[%s5197_s7 + $0x58] sm:$0xff]  ;;  %v3368_v17 = vpack.c.bf16 %v2926_v13, %v2924_v12  ;;  %v2973_v12 = vld [vmem:[%s5195_s5 + $0x2c8] sm:$0xff] }
 0x242   : > { %3313 = vmatprep.subr.bf16.mxu1 %v3312_v19  ;;  %v2931_v16 = vld [vmem:[%s5195_s5 + $0x1b8] sm:$0xff] }
 0x243   : > { %v1306_v22 = vpop.f32.mrb[4].mxu1  ;;  %3315 = vmatpush3.bf16.msra.mxu1 %v3312_v19  ;;  %v2017_v19 = vld [vmem:[%s5197_s7 + $0x50] sm:$0xff]  ;;  %3436 = vmatpush1.bf16.msra.mxu0 %v3435_v18  ;;  %v3370_v18 = vpack.c.bf16 %v2931_v16, %v2929_v15  ;;  %v2975_v13 = vld [vmem:[%s5195_s5 + $0x2d8] sm:$0xff]  ;;  %v2977_v16 = vld [vmem:[%s5195_s5 + $0x2e8] sm:$0xff] }
 0x244   : > { %v1308_v23 = vpop.f32.mrb[5].mxu1  ;;  %3437 = vmatprep.subr.bf16.mxu0 %v3712_v21  ;;  %v2974_v15 = vld [vmem:[%s5195_s5 + $0x2d0] sm:$0xff] }
 0x245   : > { %v2019_v23 = vld [vmem:[%s5197_s7 + $0x60] sm:$0xff] }
 0x246   : > { %v3441_v25 = vpack.c.bf16 %v2020_v24, %v2019_v23  ;;  %v2933_v23 = vld [vmem:[%s5195_s5 + $0x1c8] sm:$0xff]  ;;  %v2935_v24 = vld [vmem:[%s5195_s5 + $0x1d8] sm:$0xff] }
 0x247   : > { %v1311_v26 = vpop.f32.mrb[6].mxu1 }
 0x248   : > { %v3316_v27 = vpack.c.bf16 %v1311_v26, %v1306_v22  ;;  %v1313_v28 = vpop.f32.mrb[7].mxu1  ;;  %v3438_v22 = vpack.c.bf16 %v2018_v20, %v2017_v19  ;;  %v2021_v26 = vld [vmem:[%s5197_s7 + $0x70] sm:$0xff]  ;;  %v2928_v19 = vld [vmem:[%s5195_s5 + $0x1a0] sm:$0xff] }
 0x249   : > { %v2930_v20 = vld [vmem:[%s5195_s5 + $0x1b0] sm:$0xff] }
 0x24a   : > { %3318 = vmatprep.subr.msk.bf16.mxu1 %vm3317_vm5, %v3316_v27  ;;  %3439 = vmatpush1.bf16.msra.mxu0 %v3438_v22 }
 0x24b   : > { %3321 = vmatpush3.bf16.msk.msra.mxu1 %vm3317_vm5, %v3316_v27  ;;  %3440 = vmatprep.subr.bf16.mxu0 %v3712_v21  ;;  %v2022_v27 = vld [vmem:[%s5197_s7 + $0x78] sm:$0xff]  ;;  %vm2219_vm5 = vmand %vm4985_vm15, %vm4990_vm0 }
 0x24c   : > { %3323 = vmatprep.subr.bf16.mxu1 %v3322_v29  ;;  %v3444_v30 = vpack.c.bf16 %v2022_v27, %v2021_v26  ;;  %v3374_v26 = vpack.c.bf16 %v2935_v24, %v2933_v23  ;;  %v2932_v27 = vld [vmem:[%s5195_s5 + $0x1c0] sm:$0xff]  ;;  %v2978_v24 = vld [vmem:[%s5195_s5 + $0x2f0] sm:$0xff] }
 0x24d   : > { %v2976_v23 = vld [vmem:[%s5195_s5 + $0x2e0] sm:$0xff] }
 0x24e   : > { %3095 = vmatmul.mubr.msk.f32.vlgmr.msra.gmra.mrb[8].mxu1 %vm1315_vm2, %v1195_v34  ;;  %3442 = vmatpush1.bf16.msra.mxu0 %v3441_v25  ;;  %v1414_v34 = vld [vmem:[%s5195_s5 + $0x38] sm:$0xff]  ;;  %v3372_v25 = vpack.c.bf16 %v2930_v20, %v2928_v19  ;;  %v3402_v19 = vpack.c.bf16 %v2975_v13, %v2973_v12  ;;  %vm4995_vm2 = vcmp.ge.s32.totalorder %v1168_v47, 32 }
 0x24f   : > { %3325 = vmatpush1.bf16.msra.mxu1 %v3324_v35  ;;  %1530 = vmatprep.mubr.f32.mxu1 %v3711_v7  ;;  %v3344_v35 = vpack.c.bf16 %v1409_v32, %v1407_v31  ;;  %vm2242_vm10 = vmand %vm4995_vm2, %vm5000_vm4 }
 0x250   : > { %3327 = vmatprep.subr.bf16.mxu1 %v3326_v36  ;;  %3443 = vmatprep.subr.bf16.mxu0 %v3712_v21  ;;  %v3346_v36 = vpack.c.bf16 %v1414_v34, %v1412_v33  ;;  %v2936_v33 = vld [vmem:[%s5195_s5 + $0x1e0] sm:$0xff]  ;;  %v2938_v34 = vld [vmem:[%s5195_s5 + $0x1f0] sm:$0xff] }
 0x252   : > { %3445 = vmatpush1.bf16.msra.mxu0 %v3444_v30  ;;  %v2939_v30 = vld [vmem:[%s5195_s5 + $0x1f8] sm:$0xff] }
 0x253   : > { %3329 = vmatpush1.bf16.msra.mxu1 %v3328_v41  ;;  %3446 = vmatprep.subr.bf16.mxu0 %v3712_v21  ;;  %v1418_v41 = vld [vmem:[%s5195_s5 + $0x58] sm:$0xff] }
 0x254   : > { %3331 = vmatprep.subr.bf16.mxu1 %v3330_v42  ;;  %v3348_v42 = vpack.c.bf16 %v1413_v38, %v1411_v37  ;;  %v3350_v43 = vpack.c.bf16 %v1418_v41, %v1416_v40  ;;  %v2947_v37 = vld [vmem:[%s5195_s5 + $0x218] sm:$0xff]  ;;  %v2949_v38 = vld [vmem:[%s5195_s5 + $0x228] sm:$0xff]  ;;  %v2948_v40 = vld [vmem:[%s5195_s5 + $0x220] sm:$0xff] }
 0x255   : > { %v2951_v41 = vld [vmem:[%s5195_s5 + $0x238] sm:$0xff]  ;;  %v3382_v44 = vpack.c.bf16 %v2949_v38, %v2947_v37  ;;  %v2984_v37 = vld [vmem:[%s5195_s5 + $0x320] sm:$0xff]  ;;  %v2986_v38 = vld [vmem:[%s5195_s5 + $0x330] sm:$0xff] }
 0x257   : > { %3333 = vmatpush1.bf16.msra.mxu1 %v3332_v50  ;;  %v1420_v50 = vld [vmem:[%s5195_s5 + $0x68] sm:$0xff] }
 0x258   : > { %3335 = vmatprep.subr.bf16.mxu1 %v3334_v52  ;;  %v1422_v52 = vld [vmem:[%s5195_s5 + $0x78] sm:$0xff] }
 0x259   : > { %v3354_v54 = vpack.c.bf16 %v1422_v52, %v1420_v50  ;;  %v2950_v50 = vld [vmem:[%s5195_s5 + $0x230] sm:$0xff]  ;;  %v2952_v52 = vld [vmem:[%s5195_s5 + $0x240] sm:$0xff] }
 0x25b   : > { %3337 = vmatpush1.bf16.msra.mxu1 %v3336_v55  ;;  %v1419_v55 = vld [vmem:[%s5195_s5 + $0x60] sm:$0xff] }
 0x25c   : > { %3339 = vmatprep.subr.bf16.mxu1 %v3338_v58  ;;  %v1426_v58 = vld [vmem:[%s5195_s5 + $0x98] sm:$0xff]  ;;  %v3356_v59 = vpack.c.bf16 %v1421_v56, %v1419_v55  ;;  %v2957_v55 = vld [vmem:[%s5195_s5 + $0x268] sm:$0xff]  ;;  %v3388_v56 = vpack.c.bf16 %v2952_v52, %v2950_v50  ;;  %v2992_v50 = vld [vmem:[%s5195_s5 + $0x360] sm:$0xf] }
 0x25d   : > { %v3358_v60 = vpack.c.bf16 %v1426_v58, %v1424_v57  ;;  %v2954_v58 = vld [vmem:[%s5195_s5 + $0x250] sm:$0xff] }
 0x25f   : > { %3341 = vmatpush1.bf16.msra.mxu1 %v3340_v61  ;;  %v1423_v61 = vld [vmem:[%s5195_s5 + $0x80] sm:$0xff] }
 0x260   : > { %2912 = vmatprep.subr.msk.mxu1 %vm1322_vm3, %v2911_v62  ;;  %v1425_v62 = vld [vmem:[%s5195_s5 + $0x90] sm:$0xff] }
 0x261   : > { %v3360_v63 = vpack.c.bf16 %v1425_v62, %v1423_v61  ;;  %v2959_v61 = vld [vmem:[%s5195_s5 + $0x278] sm:$0xff]  ;;  %v2961_v62 = vld [vmem:[%s5195_s5 + $0x288] sm:$0xff] }
 0x263   : > { %2913 = vmatpush1.msk.msra.mxu1 %vm1322_vm3, %v2910_v1  ;;  %v2921_v1 = vld [vmem:[%s5195_s5 + $0x168] sm:$0xff] }
 0x264   : > { %3343 = vmatprep.subr.bf16.mxu1 %v3342_v2  ;;  %v2923_v2 = vld [vmem:[%s5195_s5 + $0x178] sm:$0xff] }
 0x265   : > { %v3362_v9 = vpack.c.bf16 %v2923_v2, %v2921_v1  ;;  %v2958_v1 = vld [vmem:[%s5195_s5 + $0x270] sm:$0xff]  ;;  %v2960_v2 = vld [vmem:[%s5195_s5 + $0x280] sm:$0xff] }
 0x266   : > { %v3396_v5 = vpack.c.bf16 %v2960_v2, %v2958_v1 }
 0x321   : > { %v3096_v28 = vpop.f32.mrb[8].mxu1 }
 0x322   : > { %1404 = vst.msk [vmem:[#allocation2 + $0x8] sm:$0x3f] %vm1403_vm6, %v3096_v28  ;;  %v1392_v29 = vpop.f32.mrb[9].mxu1  ;;  %v2934_v28 = vld [vmem:[%s5195_s5 + $0x1d0] sm:$0xff]  ;;  %vm5009_vm6 = vcmp.ge.s32.totalorder %v1168_v47, 112 }
 0x323   : > { %1402 = vst.msk [vmem:[#allocation2] sm:$0xff] %vm1401_vm7, %v1392_v29  ;;  %v2937_v29 = vld [vmem:[%s5195_s5 + $0x1e8] sm:$0xff]  ;;  %v3376_v31 = vpack.c.bf16 %v2934_v28, %v2932_v27  ;;  %v2983_v27 = vld [vmem:[%s5195_s5 + $0x318] sm:$0xff]  ;;  %v3408_v28 = vpack.c.bf16 %v2978_v24, %v2976_v23  ;;  %v2297_v24 = vld [vmem:[%s5199_s9] sm:$0xff] }
 0x324   : > { %v3378_v32 = vpack.c.bf16 %v2939_v30, %v2937_v29  ;;  %v2980_v30 = vld [vmem:[%s5195_s5 + $0x300] sm:$0xff]  ;;  %v2314_v23 = vld [vmem:[%s5199_s9 + $0x88] sm:$0xff] }
 0x329   : > { %v1430_v46 = vld [vmem:[#allocation2 + $0x9] sm:$0x3] }
 0x32a   : > { %v1429_v39 = vld [vmem:[#allocation2 + $0x1] sm:$0xff] }
 0x32b   : > { %2914 = vmatmul.mubr.msk.f32.vlgmr.msra.gmra.mrb[10].mxu1 %vm1401_vm7, %v1429_v39  ;;  %v1405_v14 = vld [vmem:[#allocation2] sm:$0xff]  ;;  %v1406_v22 = vld [vmem:[#allocation2 + $0x8] sm:$0x3]  ;;  %v2946_v39 = vld [vmem:[%s5195_s5 + $0x210] sm:$0xff] }
 0x32c   : > { %3345 = vmatpush1.bf16.msra.mxu1 %v3344_v35  ;;  %1536 = vmatprep.mubr.f32.mxu1 %v3711_v7  ;;  %v3380_v35 = vpack.c.bf16 %v2938_v34, %v2936_v33  ;;  %v3384_v45 = vpack.c.bf16 %v2948_v40, %v2946_v39  ;;  %v2985_v33 = vld [vmem:[%s5195_s5 + $0x328] sm:$0xff]  ;;  %v2987_v34 = vld [vmem:[%s5195_s5 + $0x338] sm:$0xff] }
 0x32d   : > { %3347 = vmatprep.subr.bf16.mxu1 %v3346_v36  ;;  %v2941_v36 = vld [vmem:[%s5195_s5 + $0x208] sm:$0xf]  ;;  %v2991_v40 = vld [vmem:[%s5195_s5 + $0x358] sm:$0xff] }
 0x32e   : > { %v2989_v39 = vld [vmem:[%s5195_s5 + $0x348] sm:$0xff] }
 0x32f   : > { %2915 = vmatmul.mubr.msk.f32.gmra.mrb[12].mxu1 %vm1401_vm7, %v1430_v46  ;;  %v1868_v52 = vld [vmem:[#allocation2 + $0x4] sm:$0xff] }
 0x330   : > { %3349 = vmatpush1.bf16.msra.mxu1 %v3348_v42  ;;  %1619 = vmatprep.mubr.f32.mxu1 %v3711_v7  ;;  %v2953_v42 = vld [vmem:[%s5195_s5 + $0x248] sm:$0xff] }
 0x331   : > { %3351 = vmatprep.subr.bf16.mxu1 %v3350_v43  ;;  %v2940_v43 = vld [vmem:[%s5195_s5 + $0x200] sm:$0xf]  ;;  %v3386_v46 = vpack.c.bf16 %v2953_v42, %v2951_v41  ;;  %v3416_v41 = vpack.c.bf16 %v2986_v38, %v2984_v37  ;;  %v3418_v42 = vpack.c.bf16 %v2991_v40, %v2989_v39  ;;  %v2334_v37 = vld [vmem:[%s5199_s9 + $0x128] sm:$0xff] }
 0x332   : > { %v2317_v38 = vld [vmem:[%s5199_s9 + $0xa0] sm:$0xff]  ;;  %v2318_v40 = vld [vmem:[%s5199_s9 + $0xa8] sm:$0xff] }
 0x334   : > { %3353 = vmatpush1.bf16.msra.mxu1 %v3352_v53  ;;  %v1632_v53 = vld [vmem:[#allocation2 + $0x2] sm:$0xff] }
 0x335   : > { %3355 = vmatprep.subr.bf16.mxu1 %v3354_v54  ;;  %v2955_v54 = vld [vmem:[%s5195_s5 + $0x258] sm:$0xff] }
 0x336   : > { %v3390_v57 = vpack.c.bf16 %v2957_v55, %v2955_v54  ;;  %v2023_v54 = vld [vmem:[%s5197_s7 + $0x80] sm:$0xff]  ;;  %v2024_v55 = vld [vmem:[%s5197_s7 + $0x88] sm:$0xff] }
 0x338   : > { %3357 = vmatpush1.bf16.msra.mxu1 %v3356_v59  ;;  %v2956_v59 = vld [vmem:[%s5195_s5 + $0x260] sm:$0xff] }
 0x339   : > { %3359 = vmatprep.subr.bf16.mxu1 %v3358_v60  ;;  %v1633_v60 = vld [vmem:[#allocation2 + $0xa] sm:$0x3] }
 0x33c   : > { %3361 = vmatpush1.bf16.msra.mxu1 %v3360_v63  ;;  %v3392_v63 = vpack.c.bf16 %v2956_v59, %v2954_v58  ;;  %v2026_v58 = vld [vmem:[%s5197_s7 + $0x98] sm:$0xff] }
 0x33d   : > { %2916 = vmatprep.subr.msk.mxu1 %vm1322_vm3, %v1428_v0  ;;  %v3394_v0 = vpack.c.bf16 %v2961_v62, %v2959_v61 }
 0x340   : > { %2917 = vmatpush1.msk.msra.mxu1 %vm1322_vm3, %v1427_v8  ;;  %v2962_v8 = vld [vmem:[%s5195_s5 + $0x290] sm:$0xff] }
 0x341   : > { %2918 = vmatmul.mubr.msk.f32.vlgmr.msra.gmra.mrb[10].mxu1 %vm1401_vm7, %v1405_v14  ;;  %3363 = vmatprep.subr.bf16.mxu1 %v3362_v9  ;;  %v2964_v9 = vld [vmem:[%s5195_s5 + $0x2a0] sm:$0xff] }
 0x342   : > { %3365 = vmatpush1.bf16.msra.mxu1 %v3364_v10  ;;  %1625 = vmatprep.mubr.f32.mxu1 %v3711_v7  ;;  %v3400_v10 = vpack.c.bf16 %v2964_v9, %v2962_v8  ;;  %v2972_v14 = vld [vmem:[%s5195_s5 + $0x2c0] sm:$0xff] }
 0x343   : > { %3367 = vmatprep.subr.bf16.mxu1 %v3366_v11  ;;  %v2967_v11 = vld [vmem:[%s5195_s5 + $0x2b8] sm:$0xf]  ;;  %v3404_v20 = vpack.c.bf16 %v2974_v15, %v2972_v14 }
 0x345   : > { %2919 = vmatmul.mubr.msk.f32.gmra.mrb[12].mxu1 %vm1401_vm7, %v1406_v22 }
 0x346   : > { %3369 = vmatpush1.bf16.msra.mxu1 %v3368_v17  ;;  %1733 = vmatprep.mubr.f32.mxu1 %v3711_v7  ;;  %v2979_v17 = vld [vmem:[%s5195_s5 + $0x2f8] sm:$0xff] }
 0x347   : > { %3371 = vmatprep.subr.bf16.mxu1 %v3370_v18  ;;  %v2966_v18 = vld [vmem:[%s5195_s5 + $0x2b0] sm:$0xf]  ;;  %v3406_v22 = vpack.c.bf16 %v2979_v17, %v2977_v16  ;;  %v2006_v17 = vld [vmem:[%s5198_s8] sm:$0x1f] }
 0x34a   : > { %3373 = vmatpush1.bf16.msra.mxu1 %v3372_v25  ;;  %v1750_v25 = vld [vmem:[#allocation2 + $0x3] sm:$0xff] }
 0x34b   : > { %3375 = vmatprep.subr.bf16.mxu1 %v3374_v26  ;;  %v2981_v26 = vld [vmem:[%s5195_s5 + $0x308] sm:$0xff] }
 0x34c   : > { %v3410_v29 = vpack.c.bf16 %v2983_v27, %v2981_v26 }
 0x34e   : > { %3377 = vmatpush1.bf16.msra.mxu1 %v3376_v31  ;;  %v2982_v31 = vld [vmem:[%s5195_s5 + $0x310] sm:$0xff] }
 0x34f   : > { %3379 = vmatprep.subr.bf16.mxu1 %v3378_v32  ;;  %v1751_v32 = vld [vmem:[#allocation2 + $0xb] sm:$0x3] }
 0x352   : > { %3381 = vmatpush1.bf16.msra.mxu1 %v3380_v35  ;;  %v3412_v35 = vpack.c.bf16 %v2982_v31, %v2980_v30  ;;  %v2315_v30 = vld [vmem:[%s5199_s9 + $0x90] sm:$0xff] }
 0x353   : > { %2942 = vmatprep.subr.msk.mxu1 %vm1322_vm3, %v2941_v36  ;;  %v3414_v36 = vpack.c.bf16 %v2987_v34, %v2985_v33  ;;  %v2299_v33 = vld [vmem:[%s5199_s9 + $0x10] sm:$0xff]  ;;  %v2300_v34 = vld [vmem:[%s5199_s9 + $0x18] sm:$0xff] }
 0x354   : > { %v3462_v39 = vpack.c.bf16 %v2300_v34, %v2299_v33  ;;  %v2310_v34 = vld [vmem:[%s5199_s9 + $0x68] sm:$0xff] }
 0x356   : > { %2943 = vmatpush1.msk.msra.mxu1 %vm1322_vm3, %v2940_v43  ;;  %v2988_v43 = vld [vmem:[%s5195_s5 + $0x340] sm:$0xff] }
 0x357   : > { %2944 = vmatmul.mubr.msk.f32.vlgmr.msra.gmra.mrb[10].mxu1 %vm1401_vm7, %v1632_v53  ;;  %3383 = vmatprep.subr.bf16.mxu1 %v3382_v44  ;;  %v2990_v44 = vld [vmem:[%s5195_s5 + $0x350] sm:$0xff]  ;;  %v1869_v53 = vld [vmem:[#allocation2 + $0xc] sm:$0x3] }
 0x358   : > { %3385 = vmatpush1.bf16.msra.mxu1 %v3384_v45  ;;  %1739 = vmatprep.mubr.f32.mxu1 %v3711_v7  ;;  %v3420_v45 = vpack.c.bf16 %v2990_v44, %v2988_v43  ;;  %v2302_v43 = vld [vmem:[%s5199_s9 + $0x28] sm:$0xff] }
 0x359   : > { %3387 = vmatprep.subr.bf16.mxu1 %v3386_v46  ;;  %v2993_v46 = vld [vmem:[%s5195_s5 + $0x368] sm:$0xf] }
 0x35b   : > { %2945 = vmatmul.mubr.msk.f32.gmra.mrb[12].mxu1 %vm1401_vm7, %v1633_v60  ;;  %v1986_v60 = vld [vmem:[%s5196_s6] sm:$0x3] }
 0x35c   : > { %3389 = vmatpush1.bf16.msra.mxu1 %v3388_v56  ;;  %1851 = vmatprep.mubr.f32.mxu1 %v3711_v7  ;;  %v3447_v56 = vpack.c.bf16 %v2024_v55, %v2023_v54  ;;  %v1991_v61 = vrot.slane %v1986_v60, %v4355_v49  ;;  %v1995_v62 = vrot.slane %v1986_v60, %v4361_v51  ;;  %v2337_v60 = vld [vmem:[%s5199_s9 + $0x140] sm:$0xff] }
 0x35d   : > { %3391 = vmatprep.subr.bf16.mxu1 %v3390_v57  ;;  %v2025_v57 = vld [vmem:[%s5197_s7 + $0x90] sm:$0xff] }
 0x35e   : > { %3448 = vmatpush1.bf16.msra.mxu0 %v3447_v56  ;;  %v3450_v59 = vpack.c.bf16 %v2026_v58, %v2025_v57  ;;  %v3715_v56 = vmov 1966171168   ;;  %v2303_v58 = vld [vmem:[%s5199_s9 + $0x30] sm:$0xff] }
 0x35f   : > { %3449 = vmatprep.subr.bf16.mxu0 %v3712_v21  ;;  %v2205_v57 = vunpack.c.l.s4 %v3715_v56 }
 0x360   : > { %3393 = vmatpush1.bf16.msra.mxu1 %v3392_v63 }
 0x361   : > { %3395 = vmatprep.subr.bf16.mxu1 %v3394_v0 }
 0x362   : > { %3451 = vmatpush1.bf16.msra.mxu0 %v3450_v59  ;;  %v2304_v59 = vld [vmem:[%s5199_s9 + $0x38] sm:$0xff] }
 0x363   : > { %3452 = vmatprep.subr.bf16.mxu0 %v3712_v21 }
 0x364   : > { %3397 = vmatpush1.bf16.msra.mxu1 %v3396_v5 }
 0x365   : > { %3399 = vmatprep.subr.bf16.mxu1 %v3398_v6 }
 0x368   : > { %3401 = vmatpush1.bf16.msra.mxu1 %v3400_v10 }
 0x369   : > { %2968 = vmatprep.subr.msk.mxu1 %vm1322_vm3, %v2967_v11 }
 0x36c   : > { %2969 = vmatpush1.msk.msra.mxu1 %vm1322_vm3, %v2966_v18  ;;  %v2329_v18 = vld [vmem:[%s5199_s9 + $0x100] sm:$0xff] }
 0x36d   : > { %2970 = vmatmul.mubr.msk.f32.vlgmr.msra.gmra.mrb[10].mxu1 %vm1401_vm7, %v1750_v25  ;;  %3403 = vmatprep.subr.bf16.mxu1 %v3402_v19  ;;  %v2330_v19 = vld [vmem:[%s5199_s9 + $0x108] sm:$0xff] }
 0x36e   : > { %3405 = vmatpush1.bf16.msra.mxu1 %v3404_v20  ;;  %1857 = vmatprep.mubr.f32.mxu1 %v3711_v7  ;;  %v2313_v20 = vld [vmem:[%s5199_s9 + $0x80] sm:$0xff]  ;;  %v2298_v25 = vld [vmem:[%s5199_s9 + $0x8] sm:$0xff] }
 0x36f   : > { %3407 = vmatprep.subr.bf16.mxu1 %v3406_v22  ;;  %v3489_v22 = vpack.c.bf16 %v2330_v19, %v2329_v18  ;;  %v3456_v26 = vpack.c.bf16 %v2314_v23, %v2313_v20  ;;  %v3458_v27 = vpack.c.bf16 %v2298_v25, %v2297_v24  ;;  %v2308_v18 = vld [vmem:[%s5199_s9 + $0x58] sm:$0xff]  ;;  %v2341_v20 = vld [vmem:[%s5199_s9 + $0x160] sm:$0xff] }
 0x370   : > { %v2325_v23 = vld [vmem:[%s5199_s9 + $0xe0] sm:$0xff] }
 0x371   : > { %2971 = vmatmul.mubr.msk.f32.gmra.mrb[12].mxu1 %vm1401_vm7, %v1751_v32  ;;  %v2316_v32 = vld [vmem:[%s5199_s9 + $0x98] sm:$0xff] }
 0x372   : > { %3409 = vmatpush1.bf16.msra.mxu1 %v3408_v28  ;;  %1969 = vmatprep.mubr.f32.mxu1 %v3711_v7  ;;  %v2331_v28 = vld [vmem:[%s5199_s9 + $0x110] sm:$0xff] }
 0x373   : > { %3411 = vmatprep.subr.bf16.mxu1 %v3410_v29  ;;  %v2332_v29 = vld [vmem:[%s5199_s9 + $0x118] sm:$0xff] }
 0x374   : > { %v3492_v31 = vpack.c.bf16 %v2332_v29, %v2331_v28  ;;  %v2326_v29 = vld [vmem:[%s5199_s9 + $0xe8] sm:$0xff] }
 0x375   : > { %v3480_v33 = vpack.c.bf16 %v2326_v29, %v2325_v23  ;;  %v2519_v23 = vld [vmem:[%s5201_s11 + $0x38] sm:$0xff] }
 0x376   : > { %3413 = vmatpush1.bf16.msra.mxu1 %v3412_v35  ;;  %v3460_v35 = vpack.c.bf16 %v2316_v32, %v2315_v30  ;;  %v2309_v30 = vld [vmem:[%s5199_s9 + $0x60] sm:$0xff]  ;;  %v2523_v29 = vld [vmem:[%s5201_s11 + $0x58] sm:$0xff] }
 0x377   : > { %3415 = vmatprep.subr.bf16.mxu1 %v3414_v36  ;;  %v2333_v36 = vld [vmem:[%s5199_s9 + $0x120] sm:$0xff] }
 0x378   : > { %v3495_v44 = vpack.c.bf16 %v2334_v37, %v2333_v36  ;;  %v3482_v37 = vpack.c.bf16 %v2310_v34, %v2309_v30  ;;  %v2526_v34 = vld [vmem:[%s5201_s11 + $0x70] sm:$0xff] }
 0x37a   : > { %3417 = vmatpush1.bf16.msra.mxu1 %v3416_v41  ;;  %v3464_v41 = vpack.c.bf16 %v2318_v40, %v2317_v38  ;;  %v2344_v38 = vld [vmem:[%s5199_s9 + $0x178] sm:$0xff] }
 0x37b   : > { %3419 = vmatprep.subr.bf16.mxu1 %v3418_v42  ;;  %v2301_v42 = vld [vmem:[%s5199_s9 + $0x20] sm:$0xff] }
 0x37e   : > { %3421 = vmatpush1.bf16.msra.mxu1 %v3420_v45  ;;  %v2319_v45 = vld [vmem:[%s5199_s9 + $0xb0] sm:$0xff] }
 0x37f   : > { %2994 = vmatprep.subr.msk.mxu1 %vm1322_vm3, %v2993_v46  ;;  %v2320_v46 = vld [vmem:[%s5199_s9 + $0xb8] sm:$0xff] }
 0x380   : > { %v3468_v54 = vpack.c.bf16 %v2320_v46, %v2319_v45 }
 0x382   : > { %2995 = vmatpush1.msk.msra.mxu1 %vm1322_vm3, %v2992_v50  ;;  %v2335_v50 = vld [vmem:[%s5199_s9 + $0x130] sm:$0xff] }
 0x383   : > { %2996 = vmatmul.mubr.msk.f32.vlgmr.msra.gmra.mrb[10].mxu1 %vm1401_vm7, %v1868_v52  ;;  %3488 = vmatprep.subr.bf16.mxu1 %v3712_v21  ;;  %v2336_v52 = vld [vmem:[%s5199_s9 + $0x138] sm:$0xff] }
 0x384   : > { %1975 = vmatprep.mubr.f32.mxu1 %v3711_v7  ;;  %3490 = vmatpush1.bf16.msra.mxu1 %v3489_v22  ;;  %v3498_v55 = vpack.c.bf16 %v2336_v52, %v2335_v50  ;;  %v2342_v22 = vld [vmem:[%s5199_s9 + $0x168] sm:$0xff]  ;;  %v2345_v50 = vld [vmem:[%s5199_s9 + $0x180] sm:$0xff] }
 0x385   : > { %3491 = vmatprep.subr.bf16.mxu1 %v3712_v21  ;;  %v2346_v52 = vld [vmem:[%s5199_s9 + $0x188] sm:$0xff] }
 0x387   : > { %2997 = vmatmul.mubr.msk.f32.gmra.mrb[12].mxu1 %vm1401_vm7, %v1869_v53  ;;  %v3466_v53 = vpack.c.bf16 %v2302_v43, %v2301_v42  ;;  %v2311_v42 = vld [vmem:[%s5199_s9 + $0x70] sm:$0xff]  ;;  %v2312_v43 = vld [vmem:[%s5199_s9 + $0x78] sm:$0xff] }
 0x388   : > { %3493 = vmatpush1.bf16.msra.mxu1 %v3492_v31  ;;  %v3486_v46 = vpack.c.bf16 %v2312_v43, %v2311_v42  ;;  %v2608_v42 = vld [vmem:[%s5203_s13 + $0x28] sm:$0xff] }
 0x389   : > { %3494 = vmatprep.subr.bf16.mxu1 %v3712_v21 }
 0x38c   : > { %3496 = vmatpush1.bf16.msra.mxu1 %v3495_v44 }
 0x38d   : > { %3497 = vmatprep.subr.bf16.mxu1 %v3712_v21 }
 0x390   : > { %3499 = vmatpush1.bf16.msra.mxu1 %v3498_v55 }
 0x391   : > { %3500 = vmatprep.subr.bf16.mxu1 %v3712_v21 }
 0x456   : > { %v1971_v63 = vpop.f32.mrb[10].mxu1 }
 0x457   : > { %v1998_v0 = vadd.f32 %v1991_v61, %v1971_v63  ;;  %v1973_v1 = vpop.f32.mrb[11].mxu1 }
 0x458   : > { %v1999_v2 = vadd.f32 %v1995_v62, %v1973_v1 }
 0x459   : > { %v2002_v5 = vmax.f32 %v1998_v0, 0.0 }
 0x45a   : > { %v2003_v3 = vmax.f32 %v1999_v2, 0.0  ;;  %v1977_v4 = vpop.f32.mrb[12].mxu1  ;;  %v2206_v2 = vunpack.c.0.s8 %v2205_v57 }
 0x45b   : > { %v2000_v6 = vadd.f32 %v1991_v61, %v1977_v4  ;;  %v1979_v8 = vpop.f32.mrb[13].mxu1  ;;  %v3470_v61 = vpack.c.bf16 %v2304_v59, %v2303_v58  ;;  %v2322_v4 = vld [vmem:[%s5199_s9 + $0xc8] sm:$0xff] }
 0x45c   : > { %v2001_v9 = vadd.f32 %v1995_v62, %v1979_v8  ;;  %2998 = vmatprep.mubr.msk.f32.mxu0 %vm2027_vm8, %v2003_v3  ;;  %v2338_v62 = vld [vmem:[%s5199_s9 + $0x148] sm:$0xff]  ;;  %v2321_v3 = vld [vmem:[%s5199_s9 + $0xc0] sm:$0xff] }
 0x45d   : > { %2099 = vmatmul.mubr.f32.vlgmr.msra.gmra.mrb[8].mxu0 %v2002_v5  ;;  %v2004_v11 = vmax.f32 %v2000_v6, 0.0  ;;  %v3501_v0 = vpack.c.bf16 %v2338_v62, %v2337_v60  ;;  %v3472_v5 = vpack.c.bf16 %v2322_v4, %v2321_v3  ;;  %v2305_v6 = vld [vmem:[%s5199_s9 + $0x40] sm:$0xff]  ;;  %v2306_v8 = vld [vmem:[%s5199_s9 + $0x48] sm:$0xff]  ;;  %v2613_v62 = vld [vmem:[%s5203_s13 + $0x50] sm:$0xf] }
 0x45e   : > { %v2005_v10 = vmax.f32 %v2001_v9, 0.0  ;;  %v2339_v9 = vld [vmem:[%s5199_s9 + $0x150] sm:$0xff] }
 0x45f   : > { %3502 = vmatpush1.bf16.msra.mxu1 %v3501_v0 }
 0x460   : > { %2999 = vmatprep.mubr.msk.f32.mxu0 %vm2027_vm8, %v2005_v10  ;;  %3503 = vmatprep.subr.bf16.mxu1 %v3712_v21  ;;  %v3474_v10 = vpack.c.bf16 %v2306_v8, %v2305_v6  ;;  %vm5014_vm8 = vcmp.lt.s32.totalorder %v1168_v47, 192 }
 0x461   : > { %2104 = vmatmul.mubr.f32.gmra.mrb[10].mxu0 %v2004_v11  ;;  %v2340_v11 = vld [vmem:[%s5199_s9 + $0x158] sm:$0xff]  ;;  %vm2268_vm15 = vmand %vm5009_vm6, %vm5014_vm8 }
 0x462   : > { %3101 = vmatprep.mubr.msk.f32.mxu0 %vm3714_vm9, %v3711_v7 }
 0x530   : > { %v2100_v12 = vpop.f32.mrb[8].mxu0 }
 0x531   : > { %v2102_v13 = vpop.f32.mrb[9].mxu0 }
 0x532   : > { %v2209_v13 = vsub.s32 %v2206_v2, %v4352_v48 }
 0x534   : > { %v2105_v14 = vpop.f32.mrb[10].mxu0 }
 0x535   : > { %v3453_v15 = vpack.c.bf16 %v2105_v14, %v2100_v12  ;;  %v2107_v16 = vpop.f32.mrb[11].mxu0  ;;  %v3504_v12 = vpack.c.bf16 %v2340_v11, %v2339_v9  ;;  %v2323_v14 = vld [vmem:[%s5199_s9 + $0xd0] sm:$0xff]  ;;  %v2359_v9 = vsub.s32 2, %v4352_v48  ;;  %v2513_v11 = vld [vmem:[%s5201_s11 + $0x8] sm:$0xff] }
 0x537   : > { %3455 = vmatpush3.bf16.msk.msra.mxu0 %vm3454_vm11, %v3453_v15  ;;  %v2324_v15 = vld [vmem:[%s5199_s9 + $0xd8] sm:$0xff]  ;;  %3505 = vmatpush1.bf16.msra.mxu1 %v3504_v12  ;;  %vm5023_vm11 = vcmp.ge.s32.totalorder %v1168_v47, 64 }
 0x538   : > { %3457 = vmatprep.subr.bf16.mxu0 %v3456_v26  ;;  %v3476_v16 = vpack.c.bf16 %v2324_v15, %v2323_v14  ;;  %3506 = vmatprep.subr.bf16.mxu1 %v3712_v21  ;;  %v3507_v26 = vpack.c.bf16 %v2342_v22, %v2341_v20  ;;  %v2518_v22 = vld [vmem:[%s5201_s11 + $0x30] sm:$0xff] }
 0x53a   : > { %3102 = vmatmul.mubr.msk.f32.vlgmr.msra.gmra.mrb[12].mxu0 %vm2109_vm12, %v2006_v17  ;;  %v2307_v17 = vld [vmem:[%s5199_s9 + $0x50] sm:$0xff]  ;;  %vm2293_vm12 = vcmp.lt.s32.totalorder %v1168_v47, 144  ;;  %v2363_v47 = vsub.s32 3, %v4352_v48 }
 0x53b   : > { %3459 = vmatpush3.bf16.msra.mxu0 %v3458_v27  ;;  %v3478_v19 = vpack.c.bf16 %v2308_v18, %v2307_v17  ;;  %3508 = vmatpush1.bf16.msra.mxu1 %v3507_v26  ;;  %vm2294_vm0 = vmand %vm5023_vm11, %vm2293_vm12  ;;  %v2514_v48 = vld [vmem:[%s5201_s11 + $0x10] sm:$0xff]  ;;  %v2515_v18 = vld [vmem:[%s5201_s11 + $0x18] sm:$0xff] }
 0x53c   : > { %3461 = vmatprep.subr.bf16.mxu0 %v3460_v35  ;;  %v2343_v35 = vld [vmem:[%s5199_s9 + $0x170] sm:$0xff]  ;;  %3509 = vmatprep.subr.bf16.mxu1 %v3712_v21  ;;  %v2521_v26 = vld [vmem:[%s5201_s11 + $0x48] sm:$0xff] }
 0x53d   : > { %v3510_v40 = vpack.c.bf16 %v2344_v38, %v2343_v35  ;;  %v2603_v35 = vld [vmem:[%s5203_s13] sm:$0xff] }
 0x53f   : > { %3463 = vmatpush3.bf16.msra.mxu0 %v3462_v39  ;;  %v2327_v39 = vld [vmem:[%s5199_s9 + $0xf0] sm:$0xff]  ;;  %3511 = vmatpush1.bf16.msra.mxu1 %v3510_v40 }
 0x540   : > { %3465 = vmatprep.subr.bf16.mxu0 %v3464_v41  ;;  %v2328_v41 = vld [vmem:[%s5199_s9 + $0xf8] sm:$0xff]  ;;  %3512 = vmatprep.subr.bf16.mxu1 %v3712_v21 }
 0x541   : > { %v3484_v45 = vpack.c.bf16 %v2328_v41, %v2327_v39  ;;  %v2606_v39 = vld [vmem:[%s5203_s13 + $0x18] sm:$0xff]  ;;  %v2607_v41 = vld [vmem:[%s5203_s13 + $0x20] sm:$0xff] }
 0x542   : > { %v3543_v43 = vpack.c.bf16 %v2608_v42, %v2607_v41 }
 0x543   : > { %3467 = vmatpush3.bf16.msra.mxu0 %v3466_v53 }
 0x544   : > { %3469 = vmatprep.subr.bf16.mxu0 %v3468_v54  ;;  %v3513_v54 = vpack.c.bf16 %v2346_v52, %v2345_v50 }
 0x546   : > { %3514 = vmatpush1.bf16.msra.mxu1 %v3513_v54 }
 0x547   : > { %3471 = vmatpush3.bf16.msra.mxu0 %v3470_v61  ;;  %3536 = vmatprep.subr.bf16.mxu1 %v3712_v21 }
 0x548   : > { %3473 = vmatprep.subr.bf16.mxu0 %v3472_v5 }
 0x54b   : > { %3475 = vmatpush3.bf16.msra.mxu0 %v3474_v10  ;;  %v2512_v10 = vld [vmem:[%s5201_s11] sm:$0xff] }
 0x54c   : > { %3477 = vmatprep.subr.bf16.mxu0 %v3476_v16 }
 0x54f   : > { %3479 = vmatpush3.bf16.msra.mxu0 %v3478_v19  ;;  %v3519_v19 = vpack.c.bf16 %v2515_v18, %v2514_v48 }
 0x550   : > { %3481 = vmatprep.subr.bf16.mxu0 %v3480_v33 }
 0x553   : > { %3483 = vmatpush3.bf16.msra.mxu0 %v3482_v37  ;;  %v2605_v37 = vld [vmem:[%s5203_s13 + $0x10] sm:$0xff] }
 0x554   : > { %3485 = vmatprep.subr.bf16.mxu0 %v3484_v45  ;;  %v3540_v40 = vpack.c.bf16 %v2606_v39, %v2605_v37  ;;  %v2610_v45 = vld [vmem:[%s5203_s13 + $0x38] sm:$0xff] }
 0x557   : > { %3487 = vmatpush3.bf16.msra.mxu0 %v3486_v46 }
 0x558   : > { %3515 = vmatprep.subr.bf16.mxu0 %v3712_v21 }
 0x60d   : > { %v2183_v63 = vpop.f32.mrb[12].mxu0 }
 0x60e   : > { %2188 = vst.msk [vmem:[#allocation3] sm:$0x1f] %vm2187_vm13, %v2183_v63  ;;  %v3103_v1 = vpop.f32.mrb[13].mxu0  ;;  %vm2263_vm13 = vcmask 916480   ;;  %v2527_v63 = vld [vmem:[%s5202_s12] sm:$0x1] }
 0x615   : > { %v3002_v24 = vld.sshfl [vmem:[#allocation3 + $0x1] sm:$0x1 pattern:$0x75316420]  ;;  %v2189_v25 = vld [vmem:[#allocation3] sm:$0x1] }
 0x616   : > { %v2210_v27 = vrot.slane %v3002_v24, %v2209_v13  ;;  %v3005_v28 = vld.sshfl [vmem:[#allocation3 + $0x4] sm:$0x1 pattern:$0x75316420]  ;;  %2194 = vst.msk [vmem:[#allocation4] sm:$0x1] %vm2192_vm14, %v2189_v25  ;;  %v3525_v24 = vpack.c.bf16 %v2519_v23, %v2518_v22 }
 0x617   : > { %v2285_v31 = vrot.slane %v3005_v28, %v2209_v13  ;;  %v3004_v32 = vld.sshfl [vmem:[#allocation3 + $0x3] sm:$0x1 pattern:$0x75316420]  ;;  %vm2289_vm14 = vcmask 523264   ;;  %v2520_v25 = vld [vmem:[%s5201_s11 + $0x40] sm:$0xff] }
 0x618   : > { %2211 = vrot.lane.b32.xlu0 %v2210_v27, %s3716_s0  ;;  %v3003_v36 = vld.sshfl [vmem:[#allocation3 + $0x2] sm:$0x1 pattern:$0x75316420]  ;;  %v2259_v44 = vrot.slane %v3004_v32, %v2209_v13  ;;  %v3528_v27 = vpack.c.bf16 %v2521_v26, %v2520_v25  ;;  %v2525_v32 = vld [vmem:[%s5201_s11 + $0x68] sm:$0xff]  ;;  %s486_s0 = scalar_lea.vmem [#allocation5], %s485_s30 }
 0x619   : > { %2286 = vrot.lane.b32.xlu1 %v2285_v31, %s3717_s21  ;;  %v2236_v53 = vrot.slane %v3003_v36, %v2209_v13  ;;  %v3516_v13 = vpack.c.bf16 %v2513_v11, %v2512_v10  ;;  %v2522_v28 = vld [vmem:[%s5201_s11 + $0x50] sm:$0xff]  ;;  %v2524_v31 = vld [vmem:[%s5201_s11 + $0x60] sm:$0xff]  ;;  %v2604_v36 = vld [vmem:[%s5203_s13 + $0x8] sm:$0xff]  ;;  %s2706_s16 = sshll.u32 %s486_s0, 4  ;;  %s2694_s21 = scalar_lea.sflag [#allocation6], %s485_s30  ;;  %s5150_s16 = int_to_ptr.vmem [resolvable:$true] %s2706_s16 }
 0x61a   : > { %v3531_v30 = vpack.c.bf16 %v2523_v29, %v2522_v28  ;;  %v3534_v33 = vpack.c.bf16 %v2525_v32, %v2524_v31  ;;  %v3537_v38 = vpack.c.bf16 %v2604_v36, %v2603_v35  ;;  %s3647_s24 = scalar_lea.vmem %s5150_s16, 16  ;;  %p3654_p0 = scmp.lt.s32.totalorder %s5150_s16, %s3652_s18 }
 0x61b   : > { %p3648_p11 = scmp.ne.s32.totalorder %s5150_s16, %s3647_s24  ;;  %p3655_p1 = scmp.lt.s32.totalorder %s3653_s17, %s3647_s24 }
 0x61c   : > { %2260 = vrot.lane.b32.xlu0 %v2259_v44, %s3718_s20  ;;  %v2609_v44 = vld [vmem:[%s5203_s13 + $0x30] sm:$0xff] }
 0x61d   : > { %2237 = vrot.lane.b32.xlu1 %v2236_v53, %s3719_s27  ;;  %v3546_v46 = vpack.c.bf16 %v2610_v45, %v2609_v44  ;;  %v2347_v53 = vld [vmem:[%s5200_s10] sm:$0x1]  ;;  %s5148_s27 = scalar_lea.hbm %s5205_s15, %s3010_s26  ;;  %p3649_p12 = pnand %p3648_p11, %p3839_p5 }
 0x61e   : > { %p3656_p2 = por %p3655_p1, %p3654_p0 }
 0x61f   : > { %p3650_p13 = pneg %p3649_p12 }
 0x621   : > { %p3657_p3 = pnand %p3656_p2, %p3650_p13 }
 0x68a   : > { %v2212_v57 = vpop.permute.xlu0 %2211 }
 0x68b   : > { %v2213_v60 = vrot.slane %v2212_v57, 7  ;;  %v2287_v61 = vpop.permute.xlu1 %2286 }
 0x68c   : > { %v2288_v2 = vrot.slane %v2287_v61, 7 }
 0x68d   : > { %v2215_v0 = vsel %vm2214_vm1, %v2213_v60, %v2212_v57  ;;  %vm2368_vm1 = vcmask 130048   ;;  %v2612_v60 = vld [vmem:[%s5203_s13 + $0x48] sm:$0xff] }
 0x68e   : > { %v2261_v3 = vpop.permute.xlu0 %2260  ;;  %2220 = vst.msk [vmem:[#allocation4] sm:$0x3] %vm2219_vm5, %v2215_v0  ;;  %v2290_v8 = vsel %vm2289_vm14, %v2288_v2, %v2287_v61 }
 0x68f   : > { %v2262_v4 = vrot.slane %v2261_v3, 7  ;;  %v2238_v5 = vpop.permute.xlu1 %2237 }
 0x690   : > { %2243 = vst.msk [vmem:[#allocation4 + $0x1] sm:$0x1] %vm2242_vm10, %v2238_v5 }
 0x691   : > { %v2264_v6 = vsel %vm2263_vm13, %v2262_v4, %v2261_v3 }
 0x692   : > { %2269 = vst.msk [vmem:[#allocation4 + $0x1] sm:$0x3] %vm2268_vm15, %v2264_v6 }
 0x693   : > { %2295 = vst.msk [vmem:[#allocation4 + $0x2] sm:$0x3] %vm2294_vm0, %v2290_v8 }
 0x69a   : > { %v2296_v12 = vld [vmem:[#allocation4] sm:$0xf] }
 0x69b   : > { %v2356_v14 = vrot.slane %v2296_v12, %v4361_v51  ;;  %v2364_v15 = vrot.slane %v2296_v12, %v2363_v47  ;;  %v2352_v16 = vrot.slane %v2296_v12, %v4355_v49  ;;  %v2360_v17 = vrot.slane %v2296_v12, %v2359_v9  ;;  %v2516_v49 = vld [vmem:[%s5201_s11 + $0x20] sm:$0xff]  ;;  %v2517_v51 = vld [vmem:[%s5201_s11 + $0x28] sm:$0xff] }
 0x69c   : > { %v3522_v20 = vpack.c.bf16 %v2517_v51, %v2516_v49 }
 0x69d   : > { %2435 = vmatprep.mubr.f32.mxu0 %v2356_v14  ;;  %3006 = vmatprep.mubr.msk.f32.mxu1 %vm2368_vm1, %v2364_v15 }
 0x69e   : > { %2436 = vmatmul.mubr.f32.vlgmr.msra.gmra.mrb[14].mxu0 %v2352_v16  ;;  %2506 = vmatmul.mubr.f32.vlgmr.msra.gmra.mrb[14].mxu1 %v2360_v17 }
 0x69f   : > { %3517 = vmatpush3.bf16.msra.mxu0 %v3516_v13  ;;  %3134 = vmatprep.mubr.msk.f32.mxu0 %vm3714_vm9, %v3711_v7 }
 0x6a0   : > { %3518 = vmatprep.subr.bf16.mxu0 %v3712_v21  ;;  %3159 = vmatprep.mubr.msk.f32.mxu1 %vm3714_vm9, %v3711_v7  ;;  %vm2528_vm9 = vcmask 982016  }
 0x6a1   : > { %3538 = vmatpush3.bf16.msra.mxu1 %v3537_v38 }
 0x6a2   : > { %3539 = vmatprep.subr.bf16.mxu1 %v3712_v21 }
 0x6a3   : > { %3520 = vmatpush3.bf16.msra.mxu0 %v3519_v19 }
 0x6a4   : > { %3521 = vmatprep.subr.bf16.mxu0 %v3712_v21 }
 0x6a5   : > { %3541 = vmatpush3.bf16.msra.mxu1 %v3540_v40 }
 0x6a6   : > { %3542 = vmatprep.subr.bf16.mxu1 %v3712_v21 }
 0x6a7   : > { %3523 = vmatpush3.bf16.msra.mxu0 %v3522_v20 }
 0x6a8   : > { %3524 = vmatprep.subr.bf16.mxu0 %v3712_v21 }
 0x6a9   : > { %3544 = vmatpush3.bf16.msra.mxu1 %v3543_v43 }
 0x6aa   : > { %3545 = vmatprep.subr.bf16.mxu1 %v3712_v21 }
 0x6ab   : > { %3526 = vmatpush3.bf16.msra.mxu0 %v3525_v24 }
 0x6ac   : > { %3527 = vmatprep.subr.bf16.mxu0 %v3712_v21 }
 0x6ad   : > { %3547 = vmatpush3.bf16.msra.mxu1 %v3546_v46 }
 0x6ae   : > { %3548 = vmatprep.subr.bf16.mxu1 %v3712_v21 }
 0x6af   : > { %3529 = vmatpush3.bf16.msra.mxu0 %v3528_v27 }
 0x6b0   : > { %3530 = vmatprep.subr.bf16.mxu0 %v3712_v21 }
 0x6b3   : > { %3532 = vmatpush3.bf16.msra.mxu0 %v3531_v30 }
 0x6b4   : > { %3533 = vmatprep.subr.bf16.mxu0 %v3712_v21  ;;  %v2611_v21 = vld [vmem:[%s5203_s13 + $0x40] sm:$0xff] }
 0x6b5   : > { %v3549_v61 = vpack.c.bf16 %v2612_v60, %v2611_v21 }
 0x6b7   : > { %3535 = vmatpush3.bf16.msra.mxu0 %v3534_v33  ;;  %3550 = vmatpush3.bf16.msra.mxu1 %v3549_v61 }
 0x6b8   : > { %3132 = vmatprep.subr.mxu0 %v3711_v7  ;;  %3157 = vmatprep.subr.mxu1 %v3711_v7  ;;  %v2614_v7 = vld [vmem:[%s5204_s14] sm:$0x1] }
 0x6bb   : > { %3133 = vmatpush3.msra.mxu0 %v2526_v34  ;;  %3158 = vmatpush3.msk.msra.mxu1 %vm1322_vm3, %v2613_v62  ;;  %vm2691_vm3 = vcmask 73728  }
 0x771   : > { %v3055_v50 = vpop.f32.mrb[14].mxu0  ;;  %v2507_v52 = vpop.f32.mrb[14].mxu1 }
 0x772   : > { %v3056_v54 = vpop.f32.mrb[15].mxu0  ;;  %v2509_v55 = vpop.f32.mrb[15].mxu1 }
 0x773   : > { %v3057_v56 = vadd.f32 %v3056_v54, %v3055_v50 }
 0x775   : > { %v2438_v57 = vadd.f32 %v3057_v56, %v2347_v53 }
 0x777   : > { %v2508_v58 = vadd.f32 %v2507_v52, %v2438_v57 }
 0x779   : > { %v2511_v59 = vmax.f32 %v2508_v58, 0.0 }
 0x77b   : > { %3135 = vmatmul.mubr.msk.f32.vlgmr.msra.gmra.mrb[16].mxu0 %vm2528_vm9, %v2511_v59 }
 0x84e   : > { %v2598_v0 = vpop.f32.mrb[16].mxu0 }
 0x84f   : > { %v2599_v1 = vadd.f32 %v2598_v0, %v2527_v63  ;;  %v3136_v2 = vpop.f32.mrb[17].mxu0 }
 0x851   : > { %v2602_v3 = vmax.f32 %v2599_v1, 0.0 }
 0x853   : > { %3160 = vmatmul.mubr.msk.f32.vlgmr.msra.gmra.mrb[16].mxu1 %vm1401_vm7, %v2602_v3 }
 0x926   : > { %v2687_v4 = vpop.f32.mrb[16].mxu1 }
 0x927   : > { %v2688_v5 = vadd.f32 %v2687_v4, %v2614_v7  ;;  %v3161_v6 = vpop.f32.mrb[17].mxu1 }
 0x929   : > { %2692 = vst.msk [vmem:[%s486_s0] sm:$0x1] %vm2691_vm3, %v2688_v5 }
 0x92a   : > { %3660 = shalt.err (!%p3657_p3)
}
 0x92b   : > { %s3661_s30 = scalar_lea.hbm %s5148_s27, 16  ;;  %s3665_s26 = scalar_lea.hbm %s5205_s15, 32 }
 0x92c   : > { %p3662_p4 = scmp.ne.s32.totalorder %s5148_s27, %s3661_s30  ;;  %p3666_p9 = scmp.lt.u32.totalorder %s5148_s27, %s5205_s15 }
 0x92d   : > { %p3667_p10 = scmp.lt.u32.totalorder %s3665_s26, %s3661_s30  ;;  %p3669_p12 = scmp.lt.u32.totalorder %s3661_s30, %s5148_s27 }
 0x92e   : > { %p3663_p7 = pnand %p3662_p4, %p3839_p5 }
 0x92f   : > { %p3668_p11 = por %p3667_p10, %p3666_p9 }
 0x930   : > { %p3664_p8 = pneg %p3663_p7 }
 0x931   : > { %p3670_p13 = por %p3669_p12, %p3668_p11 }
 0x933   : > { %p3671_p0 = pnand %p3670_p13, %p3664_p8 }
 0x935   : > { %3674 = shalt.err (!%p3671_p0)
}
 0x936   : > { %3599 = dma.vmem_to_hbm [thread:$0]  (%p3839_p5), %s5150_s16, 16, %s5148_s27, %s2694_s21  }
 0x937 PF: > { %s5236_s20 = sld [smem:[#allocation10_spill]]  ;;  %s5237_s24 = sld [smem:[#allocation8_spill]] }
 0x93d   : > { %p3605_p1 = scmp.ge.s32.totalorder %s5236_s20, 2  ;;  %s2718_s18 = sand.u32 1, %s5237_s24  }
 0x93e   : > { %s2719_s17 = scalar_lea.sflag [#allocation6], %s2718_s18 }
 0x93f   : > { %p3602_p2 = pnand %p3605_p1, %p3843_p6 }
 0x941   : > { %3692 = dma.done.wait (!%p3602_p2), %s2719_s17, 16  }
 0x942   : > { %3694 = vsyncadd (!%p3602_p2), %s2719_s17, 4294967280  ;;  %s5239_s21 = sld [smem:[#allocation11_spill]]  ;;  %s5240_s30 = sld [smem:[#allocation9_spill]] }
 0x943   : > { %s5241_s20 = sld [smem:[#allocation12_spill]]  ;;  %s5242_s18 = smov %s3701_s19 }
 0x948   : > { %p25_p3 = scmp.ge.s32.totalorder %s5239_s21, 4   ;;  %s5243_s19 = smov %s5240_s30 }
 0x94a   :  { %27 = sbr.rel (!%p25_p3) target bundleno = 5 (0x5), region = 123 }
 0x951   :  { %2723 = vsyncpa [#allocation6], 1 }
 0x952   :  { %2725 = vsyncpa [#allocation6 + $0x1], 1 }

</bundles_post_ra>
